<compile_context>
chip_gen: v5e
topology: v5e:2x2
jax: 0.10.0
libtpu: 0.0.40
codegen_flags: <defaults>
</compile_context>

<pallas_src>
import math
from functools import partial

import jax
import jax.numpy as jnp
from jax.experimental import pallas as pl
from jax.experimental.pallas import tpu as pltpu

EPS = 1e-12
HI = jax.lax.Precision.HIGHEST          # full-f32 matmuls, kernel AND reference
# The prior expert of poe() has mu=0, logvar=0, so its precision is clamped_exp(0) = 1/(1+eps).
_PRIOR_T = 1.0 / (1.0 + EPS)


def _round_up(x, m):
    return ((x + m - 1) // m) * m


# ----------------------------- elementwise helpers (usable in-kernel) ---------------------------

def _mish_fast(x):
    # mish(x) = x * tanh(softplus(x)) = x * ((1+e^x)^2 - 1) / ((1+e^x)^2 + 1)
    # -> 1 exp + 1 divide instead of exp + log1p + tanh (EUP slot is the binding unit here).
    # For x > 20 the ratio rounds to 1.0 in f32, so clamping the exp argument is exact enough.
    t = jnp.exp(jnp.minimum(x, 20.0))
    u = (1.0 + t) * (1.0 + t)
    return x * ((u - 1.0) / (u + 1.0))


def _mish_ref(x):
    # canonical nn.Mish for the pure-JAX reference: x * tanh(softplus(x))
    return x * jnp.tanh(jnp.logaddexp(x, 0.0))


def _clamped_exp(x, eps=EPS):
    # single-transcendental rewrite of `exp` from models.py:
    #   x <  0 : exp(x)          == exp(-|x|)
    #   x >= 0 : 1/(exp(-x)+eps) == 1/(exp(-|x|)+eps)
    t = jnp.exp(-jnp.abs(x))
    return jnp.where(x < 0, t, 1.0 / (t + eps))


def _clamped_exp_ref(x, eps=EPS):
    # literal port of models.py `exp` for the reference
    neg = (x < 0).astype(x.dtype) * jnp.exp(jnp.minimum(x, 0.0))
    pos = (x >= 0).astype(x.dtype) / (jnp.exp(-jnp.maximum(x, 0.0)) + eps)
    return neg + pos


def _safe_log(x, eps=EPS):
    return jnp.log(x + eps)


# ----------------------------------------- fused Pallas kernel ----------------------------------

def sct_fused_kernel(
    # activations (tiled over rows)
    x_ref, e_ref, sidx_ref,
    # weights (VMEM-resident, constant block index)
    w1_ref, w2_ref, w3_ref,        # block-diag indiv + shared encoder
    ws1_ref, ws2_ref,              # s-encoder MLP
    wd1_ref, wd2_ref,              # fused x/s decoders
    bias_ref,                      # all biases packed into one [1, B] operand
    # output slab
    out_ref,
    *, dim_z, dim_s, bias_off, out_width,
):
    f32 = jnp.float32
    tn = x_ref.shape[0]
    boff = dict(bias_off)

    def bias(name):
        a, b = boff[name]
        return bias_ref[:, a:b]

    # --- preprocess (log1p * mask) + both per-modality encoders via block-diagonal W1 ---
    h = jnp.log(x_ref[...] + 1.0) * e_ref[...]                                  # [tn, 48]
    h1 = _mish_fast(jnp.dot(h, w1_ref[...], precision=HI,
                            preferred_element_type=f32) + bias("b1"))           # [tn, 64]
    # --- shared encoder, both modalities lane-packed (block-diagonal W2 / W3) ---
    h2 = _mish_fast(jnp.dot(h1, w2_ref[...], precision=HI,
                            preferred_element_type=f32) + bias("b2"))           # [tn, 48]
    enc = jnp.dot(h2, w3_ref[...], precision=HI,
                  preferred_element_type=f32) + bias("b3")                      # [tn, 64]
    mu_rna, lv_rna = enc[:, :dim_z], enc[:, dim_z:2 * dim_z]
    mu_adt, lv_adt = enc[:, 2 * dim_z:3 * dim_z], enc[:, 3 * dim_z:]

    # --- s encoder: build one_hot(s) in-kernel from int indices (no HBM s_emb round trip) ---
    lanes = jax.lax.broadcasted_iota(jnp.int32, (tn, dim_s), 1)
    s_oh = (lanes == sidx_ref[...]).astype(f32)                                 # [tn, 4]
    hs1 = _mish_fast(jnp.dot(s_oh, ws1_ref[...], precision=HI,
                             preferred_element_type=f32) + bias("bs1"))         # [tn, 16]
    zs = jnp.dot(hs1, ws2_ref[...], precision=HI,
                 preferred_element_type=f32) + bias("bs2")                      # [tn, 32]
    mu_s, lv_s = zs[:, :dim_z], zs[:, dim_z:]

    # --- PoE with the unit-Gaussian prior folded analytically (no zero-expert stack) ---
    T_rna = _clamped_exp(-lv_rna)
    T_adt = _clamped_exp(-lv_adt)
    T_s = _clamped_exp(-lv_s)
    inv_T = 1.0 / (_PRIOR_T + T_rna + T_adt + T_s)
    z_mu = (mu_rna * T_rna + mu_adt * T_adt + mu_s * T_s) * inv_T
    z_logvar = _safe_log(inv_T)
    z = z_mu                     # eval mode: training=False, sampling=False => z = z_mu

    # --- fused decoders (block-diag): one matmul pair produces [x_r | s_r] contiguously ---
    hd = _mish_fast(jnp.dot(z, wd1_ref[...], precision=HI,
                            preferred_element_type=f32) + bias("bd1"))          # [tn, 48]
    dec = jnp.dot(hd, wd2_ref[...], precision=HI,
                  preferred_element_type=f32) + bias("bd2")                     # [tn, 52]

    # --- unimodal PoEs (prior folded analytically) ---
    inv_rna = 1.0 / (_PRIOR_T + T_rna + T_s)
    u_mu_rna = (mu_rna * T_rna + mu_s * T_s) * inv_rna
    u_lv_rna = _safe_log(inv_rna)
    inv_adt = 1.0 / (_PRIOR_T + T_adt + T_s)
    u_mu_adt = (mu_adt * T_adt + mu_s * T_s) * inv_adt
    u_lv_adt = _safe_log(inv_adt)

    # --- pack into one lane-dense slab (width multiple of 128 -> unmasked stores) ---
    pieces = [dec, z_mu, z_logvar, u_mu_rna, u_lv_rna, u_mu_adt, u_lv_adt]
    used = sum(p.shape[1] for p in pieces)
    if out_width > used:
        pieces.append(jnp.zeros((tn, out_width - used), f32))
    out_ref[...] = jnp.concatenate(pieces, axis=1)


# ----------------------------------------- wrapper ----------------------------------------------

def _pack_layout(o):
    mods = o["ref_mods"]
    fields = [("x_r", sum(o["dims_h"][m] for m in mods)), ("s_r", o["dim_s"]),
              ("z_mu", o["dim_z"]), ("z_logvar", o["dim_z"])]
    for m in mods:
        fields.append((f"u_mu_{m}", o["dim_z"]))
        fields.append((f"u_lv_{m}", o["dim_z"]))
    offsets, off = {}, 0
    for name, w in fields:
        offsets[name] = (off, off + w)
        off += w
    return offsets, _round_up(off, 128)


def _blkdiag(a, b):
    za = jnp.zeros((a.shape[0], b.shape[1]), jnp.float32)
    zb = jnp.zeros((b.shape[0], a.shape[1]), jnp.float32)
    return jnp.concatenate([jnp.concatenate([a, za], axis=1),
                            jnp.concatenate([zb, b], axis=1)], axis=0)


def _pack_weights(o, params):
    """Pre-fuse modality / shared / decoder weights into block-diagonal operands + one bias slab."""
    dim_c = o["dim_c"]
    w1r, b1r, w2, b2, w3, b3 = params["x_encs"]["rna"]           # shared w2/w3 live in every entry
    w1a, b1a = params["x_encs"]["adt"][:2]
    ws1, bs1, ws2, bs2 = params["s_enc"]
    wd1, bd1, wd2, bd2 = params["x_dec"]
    wsd1, bsd1, wsd2, bsd2 = params["s_dec"]

    W1p = _blkdiag(w1r, w1a)                                     # [48, 64]
    W2p = _blkdiag(w2, w2)                                       # [64, 48]
    W3p = _blkdiag(w3, w3)                                       # [48, 64]
    # fused decoder: z @ [wd1 | wsd1 padded onto rows dim_c..dim_z-1] -> [hd | hs]
    wsd1_pad = jnp.concatenate([jnp.zeros((dim_c, wsd1.shape[1]), jnp.float32), wsd1], axis=0)
    Wd1p = jnp.concatenate([wd1, wsd1_pad], axis=1)              # [16, 48]
    Wd2p = _blkdiag(wd2, wsd2)                                   # [48, 52]

    bias_list = [("b1", jnp.concatenate([b1r, b1a], axis=1)),
                 ("b2", jnp.concatenate([b2, b2], axis=1)),
                 ("b3", jnp.concatenate([b3, b3], axis=1)),
                 ("bs1", bs1), ("bs2", bs2),
                 ("bd1", jnp.concatenate([bd1, bsd1], axis=1)),
                 ("bd2", jnp.concatenate([bd2, bsd2], axis=1))]
    off, bias_off, parts = 0, [], []
    for name, vec in bias_list:
        bias_off.append((name, (off, off + vec.shape[1])))
        off += vec.shape[1]
        parts.append(vec)
    bias_pack = jnp.concatenate(parts, axis=1)                   # [1, 324]

    weights = [W1p, W2p, W3p, ws1, ws2, Wd1p, Wd2p, bias_pack]
    return weights, tuple(bias_off)


def sct_forward_fused(o, params, inputs, tile_n=1024):
    """Single fused kernel over the whole batch.

    tile_n: sweep 1024-2048 on real batch sizes; per-row VMEM footprint is ~1.5 KB so even
    tn=2048 (double-buffered) stays well under the 32 MiB scoped-VMEM limit set below.
    """
    mods = o["ref_mods"]
    assert mods == ["rna", "adt"], "fused kernel is specialized to the rna+adt configuration"
    x, e, s = inputs["x"], inputs["e"], inputs["s"]
    n = x[mods[0]].shape[0]

    # lane-pack the two modalities; s goes in as raw int indices (one_hot built in-kernel)
    x_pack = jnp.concatenate([x["rna"], x["adt"]], axis=1)       # [n, 48]
    e_pack = jnp.concatenate([e["rna"], e["adt"]], axis=1)       # [n, 48]
    s_idx = s["joint"].astype(jnp.int32)                         # [n, 1]

    # row tile: big enough to amortize per-step overhead, but keep >= 2 grid blocks when the
    # batch allows it so both TensorCores are used on v7x (megacore sharding of the parallel axis)
    tn_half = _round_up((n + 1) // 2, 8)
    tn = min(tile_n, tn_half if n >= 16 else _round_up(n, 8))
    n_pad = _round_up(n, tn)

    if n_pad != n:
        pad = ((0, n_pad - n), (0, 0))
        x_pack = jnp.pad(x_pack, pad)
        e_pack = jnp.pad(e_pack, pad)
        s_idx = jnp.pad(s_idx, pad)

    weights, bias_off = _pack_weights(o, params)
    offsets, out_width = _pack_layout(o)

    acts = [x_pack, e_pack, s_idx]
    act_specs = [pl.BlockSpec((tn, a.shape[1]), lambda i: (i, 0)) for a in acts]
    w_specs = [pl.BlockSpec(w.shape, lambda i: (0, 0)) for w in weights]

    kernel = partial(sct_fused_kernel, dim_z=o["dim_z"], dim_s=o["dim_s"],
                     bias_off=bias_off, out_width=out_width)

    slab = pl.pallas_call(
        kernel,
        out_shape=jax.ShapeDtypeStruct((n_pad, out_width), jnp.float32),
        grid=(n_pad // tn,),
        in_specs=act_specs + w_specs,
        out_specs=pl.BlockSpec((tn, out_width), lambda i: (i, 0)),
        compiler_params=pltpu.CompilerParams(
            dimension_semantics=("parallel",),
            vmem_limit_bytes=32 * 1024 * 1024),   # v5e default scoped VMEM is 16 MiB; keep headroom
    )(*acts, *weights)

    slab = slab[:n]

    def sl(name):
        a, b = offsets[name]
        return slab[:, a:b]

    raw = {"x_r": sl("x_r"), "s_r": sl("s_r"),
           "z_mu": sl("z_mu"), "z_logvar": sl("z_logvar")}
    for m in mods:
        raw[f"u_mu_{m}"] = sl(f"u_mu_{m}")
        raw[f"u_lv_{m}"] = sl(f"u_lv_{m}")
    return raw


def sample_gaussian(key, mu, logvar):
    # TODO(synk): utils.sample_gaussian is not provided; standard reparameterization used.
    eps_n = jax.random.normal(key, mu.shape, mu.dtype)
    return mu + eps_n * jnp.exp(0.5 * logvar)


def sct_forward(o, params, inputs, sample_key, tile_n=1024):
    mods, dims_h, dim_c = o["ref_mods"], o["dims_h"], o["dim_c"]
    raw = sct_forward_fused(o, params, inputs, tile_n=tile_n)

    z_mu, z_logvar = raw["z_mu"], raw["z_logvar"]
    z = z_mu                                  # eval mode
    c, b = z[:, :dim_c], z[:, dim_c:]

    x_r_pre, off = {}, 0
    for m in mods:
        d = dims_h[m]
        x_r_pre[m] = raw["x_r"][:, off:off + d]
        off += d
    s_r_pre = raw["s_r"]

    z_uni, c_all = {}, {}
    for m in mods:
        sample_key, sk = jax.random.split(sample_key)
        z_uni[m] = sample_gaussian(sk, raw[f"u_mu_{m}"], raw[f"u_lv_{m}"])
        c_all[m] = z_uni[m][:, :dim_c]
    c_all["joint"] = c

    return x_r_pre, s_r_pre, z_mu, z_logvar, z, c, b, z_uni, c_all


# ----------------------------------------- parameter init ---------------------------------------

def init_linear(key, fan_in, fan_out):
    # PyTorch nn.Linear default: U(-1/sqrt(fan_in), 1/sqrt(fan_in)) for weight and bias.
    kw, kb = jax.random.split(key)
    bound = 1.0 / math.sqrt(fan_in)
    w = jax.random.uniform(kw, (fan_in, fan_out), jnp.float32, -bound, bound)
    b = jax.random.uniform(kb, (1, fan_out), jnp.float32, -bound, bound)
    return w, b


def init_mlp(key, dims):
    layers = []
    for i in range(1, len(dims)):
        key, sk = jax.random.split(key)
        layers.append(init_linear(sk, dims[i - 1], dims[i]))
    return layers


def init_sct_params(key, o):
    params = {}
    key, k_shared = jax.random.split(key)
    shared = init_mlp(k_shared, o["dims_enc_x"] + [o["dim_z"] * 2])   # x_shared_enc (2 linears)
    x_encs = {}
    for m in o["ref_mods"]:
        key, km = jax.random.split(key)
        (w1, b1), = init_mlp(km, [o["dims_h"][m], o["dims_enc_x"][0]])  # x_indiv_enc
        (w2, b2), (w3, b3) = shared
        x_encs[m] = (w1, b1, w2, b2, w3, b3)
    params["x_encs"] = x_encs

    key, k1, k2, k3 = jax.random.split(key, 4)
    (w1, b1), (w2, b2) = init_mlp(k1, [o["dim_z"]] + o["dims_dec_x"] + [sum(o["dims_h"].values())])
    params["x_dec"] = (w1, b1, w2, b2)
    (w1, b1), (w2, b2) = init_mlp(k2, [o["dim_s"]] + o["dims_enc_s"] + [o["dim_z"] * 2])
    params["s_enc"] = (w1, b1, w2, b2)
    (w1, b1), (w2, b2) = init_mlp(k3, [o["dim_b"]] + o["dims_dec_s"] + [o["dim_s"]])
    params["s_dec"] = (w1, b1, w2, b2)
    return params


# ----------------------------------------- pure-JAX reference (sanity check) --------------------

def _dot(a, b):
    return jnp.dot(a, b, precision=HI)


def _ref_x_enc(x, e, p):
    w1, b1, w2, b2, w3, b3 = p
    h = jnp.log1p(x) * e
    h1 = _mish_ref(_dot(h, w1) + b1)
    h2 = _mish_ref(_dot(h1, w2) + b2)
    return _dot(h2, w3) + b3


def _ref_mlp2(x, p):
    w1, b1, w2, b2 = p
    return _dot(_mish_ref(_dot(x, w1) + b1), w2) + b2


def _ref_poe(mus, logvars):
    mus = [jnp.zeros_like(mus[0])] + list(mus)
    logvars = [jnp.zeros_like(logvars[0])] + list(logvars)
    ms, lv = jnp.stack(mus, 0), jnp.stack(logvars, 0)
    T = _clamped_exp_ref(-lv)
    T_sum = T.sum(0)
    return (ms * T).sum(0) / T_sum, _safe_log(1.0 / T_sum)


# --------------------------------------------- main ---------------------------------------------

if __name__ == "__main__":
    o = {
        "ref_mods": ["rna", "adt"],
        "dims_h": {"rna": 32, "adt": 16},
        "dims_enc_x": [32, 24],
        "dim_z": 16,
        "dim_c": 10,
        "dim_b": 6,
        "dims_dec_x": [32],
        "dim_s": 4,
        "dims_enc_s": [16],
        "dims_dec_s": [16],
    }
    N = 20   # not a multiple of 8 -> exercises padding; wrapper picks tn=16 -> 2-block grid

    key = jax.random.PRNGKey(0)
    key, kp, kx1, kx2, ke1, ke2, ks, ksample = jax.random.split(key, 8)

    params = init_sct_params(kp, o)

    x = {
        "rna": jax.random.uniform(kx1, (N, o["dims_h"]["rna"]), jnp.float32, 0.0, 10.0),
        "adt": jax.random.uniform(kx2, (N, o["dims_h"]["adt"]), jnp.float32, 0.0, 10.0),
    }
    e = {
        "rna": (jax.random.uniform(ke1, (N, o["dims_h"]["rna"])) > 0.2).astype(jnp.float32),
        "adt": (jax.random.uniform(ke2, (N, o["dims_h"]["adt"])) > 0.2).astype(jnp.float32),
    }
    s = {"joint": jax.random.randint(ks, (N, 1), 0, o["dim_s"], jnp.int32)}
    inputs = {"x": x, "e": e, "s": s}

    # fused-kernel raw outputs (deterministic part) + full forward (includes unimodal sampling)
    raw = jax.block_until_ready(sct_forward_fused(o, params, inputs))
    outs = jax.block_until_ready(sct_forward(o, params, inputs, ksample))
    x_r_pre, s_r_pre, z_mu, z_logvar, z, c, b, z_uni, c_all = outs

    # ---------------- reference check of the fused hot path ----------------
    dz, dc = o["dim_z"], o["dim_c"]
    enc_ref = {m: _ref_x_enc(x[m], e[m], params["x_encs"][m]) for m in o["ref_mods"]}
    s_pp = jax.nn.one_hot(s["joint"][:, 0], o["dim_s"], dtype=jnp.float32)
    zs = _ref_mlp2(s_pp, params["s_enc"])
    ref_mus = [enc_ref[m][:, :dz] for m in o["ref_mods"]] + [zs[:, :dz]]
    ref_lvs = [enc_ref[m][:, dz:] for m in o["ref_mods"]] + [zs[:, dz:]]
    z_mu_ref, z_logvar_ref = _ref_poe(ref_mus, ref_lvs)
    x_r_ref = _ref_mlp2(z_mu_ref, params["x_dec"])
    s_r_ref = _ref_mlp2(z_mu_ref[:, dc:], params["s_dec"])

    # kernel uses the algebraically-identical fast mish / single-exp clamped_exp; 1e-3 covers
    # the residual float round-off between the two formulations (structural bugs are >> 1e-2).
    tol = dict(atol=1e-3, rtol=1e-3)
    assert jnp.allclose(raw["z_mu"], z_mu_ref, **tol)
    assert jnp.allclose(raw["z_logvar"], z_logvar_ref, **tol)
    assert jnp.allclose(raw["x_r"], x_r_ref, **tol)
    assert jnp.allclose(raw["s_r"], s_r_ref, **tol)
    for m in o["ref_mods"]:
        u_mu_ref, u_lv_ref = _ref_poe([enc_ref[m][:, :dz], zs[:, :dz]],
                                      [enc_ref[m][:, dz:], zs[:, dz:]])
        assert jnp.allclose(raw[f"u_mu_{m}"], u_mu_ref, **tol)
        assert jnp.allclose(raw[f"u_lv_{m}"], u_lv_ref, **tol)

    # forward outputs consistent with the fused raw tensors
    assert jnp.allclose(z_mu, raw["z_mu"], **tol)
    assert jnp.allclose(jnp.concatenate([x_r_pre[m] for m in o["ref_mods"]], axis=1),
                        raw["x_r"], **tol)
    assert jnp.allclose(s_r_pre, raw["s_r"], **tol)
    assert c.shape == (N, o["dim_c"]) and b.shape == (N, o["dim_b"])
    assert all(z_uni[m].shape == (N, o["dim_z"]) for m in o["ref_mods"])

    print("KERNEL_OK")
</pallas_src>

<mosaic_0001>
module attributes {stable_mosaic.version = 11 : i64} {
  func.func @sct_fused_kernel(%arg0: i32, %arg1: memref<16x48xf32, #tpu.memory_space<vmem>>, %arg2: memref<16x48xf32, #tpu.memory_space<vmem>>, %arg3: memref<16x1xi32, #tpu.memory_space<vmem>>, %arg4: memref<48x64xf32, #tpu.memory_space<vmem>>, %arg5: memref<64x48xf32, #tpu.memory_space<vmem>>, %arg6: memref<48x64xf32, #tpu.memory_space<vmem>>, %arg7: memref<4x16xf32, #tpu.memory_space<vmem>>, %arg8: memref<16x32xf32, #tpu.memory_space<vmem>>, %arg9: memref<16x48xf32, #tpu.memory_space<vmem>>, %arg10: memref<48x52xf32, #tpu.memory_space<vmem>>, %arg11: memref<1x324xf32, #tpu.memory_space<vmem>>, %arg12: memref<16x256xf32, #tpu.memory_space<vmem>>) attributes {dimension_semantics = [#tpu.dimension_semantics<parallel>], iteration_bounds = array<i64: 2>, scalar_prefetch = 0 : i64, scratch_operands = 0 : i64, tpu.core_type = #tpu.core_type<tc>, window_params = [{transform_indices = @transform_0, window_bounds = array<i64: 16, 48>}, {transform_indices = @transform_1, window_bounds = array<i64: 16, 48>}, {transform_indices = @transform_2, window_bounds = array<i64: 16, 1>}, {pipeline_mode = #tpu.pipeline_mode<synchronous>, transform_indices = @transform_3, window_bounds = array<i64: 48, 64>}, {pipeline_mode = #tpu.pipeline_mode<synchronous>, transform_indices = @transform_4, window_bounds = array<i64: 64, 48>}, {pipeline_mode = #tpu.pipeline_mode<synchronous>, transform_indices = @transform_5, window_bounds = array<i64: 48, 64>}, {pipeline_mode = #tpu.pipeline_mode<synchronous>, transform_indices = @transform_6, window_bounds = array<i64: 4, 16>}, {pipeline_mode = #tpu.pipeline_mode<synchronous>, transform_indices = @transform_7, window_bounds = array<i64: 16, 32>}, {pipeline_mode = #tpu.pipeline_mode<synchronous>, transform_indices = @transform_8, window_bounds = array<i64: 16, 48>}, {pipeline_mode = #tpu.pipeline_mode<synchronous>, transform_indices = @transform_9, window_bounds = array<i64: 48, 52>}, {pipeline_mode = #tpu.pipeline_mode<synchronous>, transform_indices = @transform_10, window_bounds = array<i64: 1, 324>}, {transform_indices = @transform_11, window_bounds = array<i64: 16, 256>}]} {
    %c0 = arith.constant 0 : index
    %c0_0 = arith.constant 0 : index
    %0 = vector.load %arg1[%c0, %c0_0] : memref<16x48xf32, #tpu.memory_space<vmem>>, vector<16x48xf32>
    %cst = arith.constant 1.000000e+00 : f32
    %1 = vector.broadcast %cst : f32 to vector<16x48xf32>
    %2 = arith.addf %0, %1 : vector<16x48xf32>
    %3 = math.log %2 : vector<16x48xf32>
    %c0_1 = arith.constant 0 : index
    %c0_2 = arith.constant 0 : index
    %4 = vector.load %arg2[%c0_1, %c0_2] : memref<16x48xf32, #tpu.memory_space<vmem>>, vector<16x48xf32>
    %5 = arith.mulf %3, %4 : vector<16x48xf32>
    %c0_3 = arith.constant 0 : index
    %c0_4 = arith.constant 0 : index
    %6 = vector.load %arg4[%c0_3, %c0_4] : memref<48x64xf32, #tpu.memory_space<vmem>>, vector<48x64xf32>
    %cst_5 = arith.constant dense<0.000000e+00> : vector<16x64xf32>
    %7 = tpu.matmul %5, %6, %cst_5 {dimension_numbers = #tpu.dot_dimension_numbers<[1], [0], [0], [1], [0, 0, 1, 1], [], []>, precision = #tpu.contract_precision<fp32>} : vector<16x48xf32>, vector<48x64xf32>, vector<16x64xf32> -> vector<16x64xf32>
    %c0_6 = arith.constant 0 : index
    %c0_7 = arith.constant 0 : index
    %8 = vector.load %arg11[%c0_6, %c0_7] : memref<1x324xf32, #tpu.memory_space<vmem>>, vector<1x64xf32>
    %9 = vector.broadcast %8 : vector<1x64xf32> to vector<16x64xf32>
    %10 = arith.addf %7, %9 : vector<16x64xf32>
    %cst_8 = arith.constant 2.000000e+01 : f32
    %11 = vector.broadcast %cst_8 : f32 to vector<16x64xf32>
    %12 = arith.minimumf %10, %11 : vector<16x64xf32>
    %13 = math.exp %12 : vector<16x64xf32>
    %cst_9 = arith.constant 1.000000e+00 : f32
    %14 = vector.broadcast %cst_9 : f32 to vector<16x64xf32>
    %15 = arith.addf %14, %13 : vector<16x64xf32>
    %cst_10 = arith.constant 1.000000e+00 : f32
    %16 = vector.broadcast %cst_10 : f32 to vector<16x64xf32>
    %17 = arith.addf %16, %13 : vector<16x64xf32>
    %18 = arith.mulf %15, %17 : vector<16x64xf32>
    %cst_11 = arith.constant 1.000000e+00 : f32
    %19 = vector.broadcast %cst_11 : f32 to vector<16x64xf32>
    %20 = arith.subf %18, %19 : vector<16x64xf32>
    %cst_12 = arith.constant 1.000000e+00 : f32
    %21 = vector.broadcast %cst_12 : f32 to vector<16x64xf32>
    %22 = arith.addf %18, %21 : vector<16x64xf32>
    %23 = arith.divf %20, %22 : vector<16x64xf32>
    %24 = arith.mulf %10, %23 : vector<16x64xf32>
    %c0_13 = arith.constant 0 : index
    %c0_14 = arith.constant 0 : index
    %25 = vector.load %arg5[%c0_13, %c0_14] : memref<64x48xf32, #tpu.memory_space<vmem>>, vector<64x48xf32>
    %cst_15 = arith.constant dense<0.000000e+00> : vector<16x48xf32>
    %26 = tpu.matmul %24, %25, %cst_15 {dimension_numbers = #tpu.dot_dimension_numbers<[1], [0], [0], [1], [0, 0, 1, 1], [], []>, precision = #tpu.contract_precision<fp32>} : vector<16x64xf32>, vector<64x48xf32>, vector<16x48xf32> -> vector<16x48xf32>
    %c0_16 = arith.constant 0 : index
    %c64 = arith.constant 64 : index
    %27 = vector.load %arg11[%c0_16, %c64] : memref<1x324xf32, #tpu.memory_space<vmem>>, vector<1x48xf32>
    %28 = vector.broadcast %27 : vector<1x48xf32> to vector<16x48xf32>
    %29 = arith.addf %26, %28 : vector<16x48xf32>
    %cst_17 = arith.constant 2.000000e+01 : f32
    %30 = vector.broadcast %cst_17 : f32 to vector<16x48xf32>
    %31 = arith.minimumf %29, %30 : vector<16x48xf32>
    %32 = math.exp %31 : vector<16x48xf32>
    %cst_18 = arith.constant 1.000000e+00 : f32
    %33 = vector.broadcast %cst_18 : f32 to vector<16x48xf32>
    %34 = arith.addf %33, %32 : vector<16x48xf32>
    %cst_19 = arith.constant 1.000000e+00 : f32
    %35 = vector.broadcast %cst_19 : f32 to vector<16x48xf32>
    %36 = arith.addf %35, %32 : vector<16x48xf32>
    %37 = arith.mulf %34, %36 : vector<16x48xf32>
    %cst_20 = arith.constant 1.000000e+00 : f32
    %38 = vector.broadcast %cst_20 : f32 to vector<16x48xf32>
    %39 = arith.subf %37, %38 : vector<16x48xf32>
    %cst_21 = arith.constant 1.000000e+00 : f32
    %40 = vector.broadcast %cst_21 : f32 to vector<16x48xf32>
    %41 = arith.addf %37, %40 : vector<16x48xf32>
    %42 = arith.divf %39, %41 : vector<16x48xf32>
    %43 = arith.mulf %29, %42 : vector<16x48xf32>
    %c0_22 = arith.constant 0 : index
    %c0_23 = arith.constant 0 : index
    %44 = vector.load %arg6[%c0_22, %c0_23] : memref<48x64xf32, #tpu.memory_space<vmem>>, vector<48x64xf32>
    %cst_24 = arith.constant dense<0.000000e+00> : vector<16x64xf32>
    %45 = tpu.matmul %43, %44, %cst_24 {dimension_numbers = #tpu.dot_dimension_numbers<[1], [0], [0], [1], [0, 0, 1, 1], [], []>, precision = #tpu.contract_precision<fp32>} : vector<16x48xf32>, vector<48x64xf32>, vector<16x64xf32> -> vector<16x64xf32>
    %c0_25 = arith.constant 0 : index
    %c112 = arith.constant 112 : index
    %46 = vector.load %arg11[%c0_25, %c112] : memref<1x324xf32, #tpu.memory_space<vmem>>, vector<1x64xf32>
    %47 = vector.broadcast %46 : vector<1x64xf32> to vector<16x64xf32>
    %48 = arith.addf %45, %47 : vector<16x64xf32>
    %49 = vector.extract_strided_slice %48 {offsets = [0, 0], sizes = [16, 16], strides = [1, 1]} : vector<16x64xf32> to vector<16x16xf32>
    %50 = vector.extract_strided_slice %48 {offsets = [0, 16], sizes = [16, 16], strides = [1, 1]} : vector<16x64xf32> to vector<16x16xf32>
    %51 = vector.extract_strided_slice %48 {offsets = [0, 32], sizes = [16, 16], strides = [1, 1]} : vector<16x64xf32> to vector<16x16xf32>
    %52 = vector.extract_strided_slice %48 {offsets = [0, 48], sizes = [16, 16], strides = [1, 1]} : vector<16x64xf32> to vector<16x16xf32>
    %53 = tpu.iota {dimensions = array<i32: 1>} : vector<16x4xi32>
    %c0_26 = arith.constant 0 : index
    %c0_27 = arith.constant 0 : index
    %54 = vector.load %arg3[%c0_26, %c0_27] : memref<16x1xi32, #tpu.memory_space<vmem>>, vector<16x1xi32>
    %55 = vector.broadcast %54 : vector<16x1xi32> to vector<16x4xi32>
    %56 = arith.cmpi eq, %53, %55 : vector<16x4xi32>
    %57 = arith.extui %56 : vector<16x4xi1> to vector<16x4xi32>
    %58 = arith.sitofp %57 : vector<16x4xi32> to vector<16x4xf32>
    %c0_28 = arith.constant 0 : index
    %c0_29 = arith.constant 0 : index
    %59 = vector.load %arg7[%c0_28, %c0_29] : memref<4x16xf32, #tpu.memory_space<vmem>>, vector<4x16xf32>
    %cst_30 = arith.constant dense<0.000000e+00> : vector<16x16xf32>
    %60 = tpu.matmul %58, %59, %cst_30 {dimension_numbers = #tpu.dot_dimension_numbers<[1], [0], [0], [1], [0, 0, 1, 1], [], []>, precision = #tpu.contract_precision<fp32>} : vector<16x4xf32>, vector<4x16xf32>, vector<16x16xf32> -> vector<16x16xf32>
    %c0_31 = arith.constant 0 : index
    %c176 = arith.constant 176 : index
    %61 = vector.load %arg11[%c0_31, %c176] : memref<1x324xf32, #tpu.memory_space<vmem>>, vector<1x16xf32>
    %62 = vector.broadcast %61 : vector<1x16xf32> to vector<16x16xf32>
    %63 = arith.addf %60, %62 : vector<16x16xf32>
    %cst_32 = arith.constant 2.000000e+01 : f32
    %64 = vector.broadcast %cst_32 : f32 to vector<16x16xf32>
    %65 = arith.minimumf %63, %64 : vector<16x16xf32>
    %66 = math.exp %65 : vector<16x16xf32>
    %cst_33 = arith.constant 1.000000e+00 : f32
    %67 = vector.broadcast %cst_33 : f32 to vector<16x16xf32>
    %68 = arith.addf %67, %66 : vector<16x16xf32>
    %cst_34 = arith.constant 1.000000e+00 : f32
    %69 = vector.broadcast %cst_34 : f32 to vector<16x16xf32>
    %70 = arith.addf %69, %66 : vector<16x16xf32>
    %71 = arith.mulf %68, %70 : vector<16x16xf32>
    %cst_35 = arith.constant 1.000000e+00 : f32
    %72 = vector.broadcast %cst_35 : f32 to vector<16x16xf32>
    %73 = arith.subf %71, %72 : vector<16x16xf32>
    %cst_36 = arith.constant 1.000000e+00 : f32
    %74 = vector.broadcast %cst_36 : f32 to vector<16x16xf32>
    %75 = arith.addf %71, %74 : vector<16x16xf32>
    %76 = arith.divf %73, %75 : vector<16x16xf32>
    %77 = arith.mulf %63, %76 : vector<16x16xf32>
    %c0_37 = arith.constant 0 : index
    %c0_38 = arith.constant 0 : index
    %78 = vector.load %arg8[%c0_37, %c0_38] : memref<16x32xf32, #tpu.memory_space<vmem>>, vector<16x32xf32>
    %cst_39 = arith.constant dense<0.000000e+00> : vector<16x32xf32>
    %79 = tpu.matmul %77, %78, %cst_39 {dimension_numbers = #tpu.dot_dimension_numbers<[1], [0], [0], [1], [0, 0, 1, 1], [], []>, precision = #tpu.contract_precision<fp32>} : vector<16x16xf32>, vector<16x32xf32>, vector<16x32xf32> -> vector<16x32xf32>
    %c0_40 = arith.constant 0 : index
    %c192 = arith.constant 192 : index
    %80 = vector.load %arg11[%c0_40, %c192] : memref<1x324xf32, #tpu.memory_space<vmem>>, vector<1x32xf32>
    %81 = vector.broadcast %80 : vector<1x32xf32> to vector<16x32xf32>
    %82 = arith.addf %79, %81 : vector<16x32xf32>
    %83 = vector.extract_strided_slice %82 {offsets = [0, 0], sizes = [16, 16], strides = [1, 1]} : vector<16x32xf32> to vector<16x16xf32>
    %84 = vector.extract_strided_slice %82 {offsets = [0, 16], sizes = [16, 16], strides = [1, 1]} : vector<16x32xf32> to vector<16x16xf32>
    %cst_41 = arith.constant 0.000000e+00 : f32
    %85 = vector.broadcast %cst_41 : f32 to vector<16x16xf32>
    %86 = arith.subf %85, %50 : vector<16x16xf32>
    %87 = math.absf %86 : vector<16x16xf32>
    %cst_42 = arith.constant 0.000000e+00 : f32
    %88 = vector.broadcast %cst_42 : f32 to vector<16x16xf32>
    %89 = arith.subf %88, %87 : vector<16x16xf32>
    %90 = math.exp %89 : vector<16x16xf32>
    %cst_43 = arith.constant 0.000000e+00 : f32
    %91 = vector.broadcast %cst_43 : f32 to vector<16x16xf32>
    %92 = arith.cmpf olt, %86, %91 : vector<16x16xf32>
    %cst_44 = arith.constant 9.99999996E-13 : f32
    %93 = vector.broadcast %cst_44 : f32 to vector<16x16xf32>
    %94 = arith.addf %90, %93 : vector<16x16xf32>
    %cst_45 = arith.constant 1.000000e+00 : f32
    %95 = vector.broadcast %cst_45 : f32 to vector<16x16xf32>
    %96 = arith.divf %95, %94 : vector<16x16xf32>
    %97 = arith.select %92, %90, %96 : vector<16x16xi1>, vector<16x16xf32>
    %cst_46 = arith.constant 0.000000e+00 : f32
    %98 = vector.broadcast %cst_46 : f32 to vector<16x16xf32>
    %99 = arith.subf %98, %52 : vector<16x16xf32>
    %100 = math.absf %99 : vector<16x16xf32>
    %cst_47 = arith.constant 0.000000e+00 : f32
    %101 = vector.broadcast %cst_47 : f32 to vector<16x16xf32>
    %102 = arith.subf %101, %100 : vector<16x16xf32>
    %103 = math.exp %102 : vector<16x16xf32>
    %cst_48 = arith.constant 0.000000e+00 : f32
    %104 = vector.broadcast %cst_48 : f32 to vector<16x16xf32>
    %105 = arith.cmpf olt, %99, %104 : vector<16x16xf32>
    %cst_49 = arith.constant 9.99999996E-13 : f32
    %106 = vector.broadcast %cst_49 : f32 to vector<16x16xf32>
    %107 = arith.addf %103, %106 : vector<16x16xf32>
    %cst_50 = arith.constant 1.000000e+00 : f32
    %108 = vector.broadcast %cst_50 : f32 to vector<16x16xf32>
    %109 = arith.divf %108, %107 : vector<16x16xf32>
    %110 = arith.select %105, %103, %109 : vector<16x16xi1>, vector<16x16xf32>
    %cst_51 = arith.constant 0.000000e+00 : f32
    %111 = vector.broadcast %cst_51 : f32 to vector<16x16xf32>
    %112 = arith.subf %111, %84 : vector<16x16xf32>
    %113 = math.absf %112 : vector<16x16xf32>
    %cst_52 = arith.constant 0.000000e+00 : f32
    %114 = vector.broadcast %cst_52 : f32 to vector<16x16xf32>
    %115 = arith.subf %114, %113 : vector<16x16xf32>
    %116 = math.exp %115 : vector<16x16xf32>
    %cst_53 = arith.constant 0.000000e+00 : f32
    %117 = vector.broadcast %cst_53 : f32 to vector<16x16xf32>
    %118 = arith.cmpf olt, %112, %117 : vector<16x16xf32>
    %cst_54 = arith.constant 9.99999996E-13 : f32
    %119 = vector.broadcast %cst_54 : f32 to vector<16x16xf32>
    %120 = arith.addf %116, %119 : vector<16x16xf32>
    %cst_55 = arith.constant 1.000000e+00 : f32
    %121 = vector.broadcast %cst_55 : f32 to vector<16x16xf32>
    %122 = arith.divf %121, %120 : vector<16x16xf32>
    %123 = arith.select %118, %116, %122 : vector<16x16xi1>, vector<16x16xf32>
    %cst_56 = arith.constant 1.000000e+00 : f32
    %124 = vector.broadcast %cst_56 : f32 to vector<16x16xf32>
    %125 = arith.addf %124, %97 : vector<16x16xf32>
    %126 = arith.addf %125, %110 : vector<16x16xf32>
    %127 = arith.addf %126, %123 : vector<16x16xf32>
    %cst_57 = arith.constant 1.000000e+00 : f32
    %128 = vector.broadcast %cst_57 : f32 to vector<16x16xf32>
    %129 = arith.divf %128, %127 : vector<16x16xf32>
    %130 = arith.mulf %49, %97 : vector<16x16xf32>
    %131 = arith.mulf %51, %110 : vector<16x16xf32>
    %132 = arith.addf %130, %131 : vector<16x16xf32>
    %133 = arith.mulf %83, %123 : vector<16x16xf32>
    %134 = arith.addf %132, %133 : vector<16x16xf32>
    %135 = arith.mulf %134, %129 : vector<16x16xf32>
    %cst_58 = arith.constant 9.99999996E-13 : f32
    %136 = vector.broadcast %cst_58 : f32 to vector<16x16xf32>
    %137 = arith.addf %129, %136 : vector<16x16xf32>
    %138 = math.log %137 : vector<16x16xf32>
    %c0_59 = arith.constant 0 : index
    %c0_60 = arith.constant 0 : index
    %139 = vector.load %arg9[%c0_59, %c0_60] : memref<16x48xf32, #tpu.memory_space<vmem>>, vector<16x48xf32>
    %cst_61 = arith.constant dense<0.000000e+00> : vector<16x48xf32>
    %140 = tpu.matmul %135, %139, %cst_61 {dimension_numbers = #tpu.dot_dimension_numbers<[1], [0], [0], [1], [0, 0, 1, 1], [], []>, precision = #tpu.contract_precision<fp32>} : vector<16x16xf32>, vector<16x48xf32>, vector<16x48xf32> -> vector<16x48xf32>
    %c0_62 = arith.constant 0 : index
    %c224 = arith.constant 224 : index
    %141 = vector.load %arg11[%c0_62, %c224] : memref<1x324xf32, #tpu.memory_space<vmem>>, vector<1x48xf32>
    %142 = vector.broadcast %141 : vector<1x48xf32> to vector<16x48xf32>
    %143 = arith.addf %140, %142 : vector<16x48xf32>
    %cst_63 = arith.constant 2.000000e+01 : f32
    %144 = vector.broadcast %cst_63 : f32 to vector<16x48xf32>
    %145 = arith.minimumf %143, %144 : vector<16x48xf32>
    %146 = math.exp %145 : vector<16x48xf32>
    %cst_64 = arith.constant 1.000000e+00 : f32
    %147 = vector.broadcast %cst_64 : f32 to vector<16x48xf32>
    %148 = arith.addf %147, %146 : vector<16x48xf32>
    %cst_65 = arith.constant 1.000000e+00 : f32
    %149 = vector.broadcast %cst_65 : f32 to vector<16x48xf32>
    %150 = arith.addf %149, %146 : vector<16x48xf32>
    %151 = arith.mulf %148, %150 : vector<16x48xf32>
    %cst_66 = arith.constant 1.000000e+00 : f32
    %152 = vector.broadcast %cst_66 : f32 to vector<16x48xf32>
    %153 = arith.subf %151, %152 : vector<16x48xf32>
    %cst_67 = arith.constant 1.000000e+00 : f32
    %154 = vector.broadcast %cst_67 : f32 to vector<16x48xf32>
    %155 = arith.addf %151, %154 : vector<16x48xf32>
    %156 = arith.divf %153, %155 : vector<16x48xf32>
    %157 = arith.mulf %143, %156 : vector<16x48xf32>
    %c0_68 = arith.constant 0 : index
    %c0_69 = arith.constant 0 : index
    %158 = vector.load %arg10[%c0_68, %c0_69] : memref<48x52xf32, #tpu.memory_space<vmem>>, vector<48x52xf32>
    %cst_70 = arith.constant dense<0.000000e+00> : vector<16x52xf32>
    %159 = tpu.matmul %157, %158, %cst_70 {dimension_numbers = #tpu.dot_dimension_numbers<[1], [0], [0], [1], [0, 0, 1, 1], [], []>, precision = #tpu.contract_precision<fp32>} : vector<16x48xf32>, vector<48x52xf32>, vector<16x52xf32> -> vector<16x52xf32>
    %c0_71 = arith.constant 0 : index
    %c272 = arith.constant 272 : index
    %160 = vector.load %arg11[%c0_71, %c272] : memref<1x324xf32, #tpu.memory_space<vmem>>, vector<1x52xf32>
    %161 = vector.broadcast %160 : vector<1x52xf32> to vector<16x52xf32>
    %162 = arith.addf %159, %161 : vector<16x52xf32>
    %cst_72 = arith.constant 1.000000e+00 : f32
    %163 = vector.broadcast %cst_72 : f32 to vector<16x16xf32>
    %164 = arith.addf %163, %97 : vector<16x16xf32>
    %165 = arith.addf %164, %123 : vector<16x16xf32>
    %cst_73 = arith.constant 1.000000e+00 : f32
    %166 = vector.broadcast %cst_73 : f32 to vector<16x16xf32>
    %167 = arith.divf %166, %165 : vector<16x16xf32>
    %168 = arith.mulf %49, %97 : vector<16x16xf32>
    %169 = arith.mulf %83, %123 : vector<16x16xf32>
    %170 = arith.addf %168, %169 : vector<16x16xf32>
    %171 = arith.mulf %170, %167 : vector<16x16xf32>
    %cst_74 = arith.constant 9.99999996E-13 : f32
    %172 = vector.broadcast %cst_74 : f32 to vector<16x16xf32>
    %173 = arith.addf %167, %172 : vector<16x16xf32>
    %174 = math.log %173 : vector<16x16xf32>
    %cst_75 = arith.constant 1.000000e+00 : f32
    %175 = vector.broadcast %cst_75 : f32 to vector<16x16xf32>
    %176 = arith.addf %175, %110 : vector<16x16xf32>
    %177 = arith.addf %176, %123 : vector<16x16xf32>
    %cst_76 = arith.constant 1.000000e+00 : f32
    %178 = vector.broadcast %cst_76 : f32 to vector<16x16xf32>
    %179 = arith.divf %178, %177 : vector<16x16xf32>
    %180 = arith.mulf %51, %110 : vector<16x16xf32>
    %181 = arith.mulf %83, %123 : vector<16x16xf32>
    %182 = arith.addf %180, %181 : vector<16x16xf32>
    %183 = arith.mulf %182, %179 : vector<16x16xf32>
    %cst_77 = arith.constant 9.99999996E-13 : f32
    %184 = vector.broadcast %cst_77 : f32 to vector<16x16xf32>
    %185 = arith.addf %179, %184 : vector<16x16xf32>
    %186 = math.log %185 : vector<16x16xf32>
    %cst_78 = arith.constant 0.000000e+00 : f32
    %187 = vector.broadcast %cst_78 : f32 to vector<16x108xf32>
    %188 = tpu.concatenate %162, %135, %138, %171, %174, %183, %186, %187 in 1 : vector<16x52xf32>, vector<16x16xf32>, vector<16x16xf32>, vector<16x16xf32>, vector<16x16xf32>, vector<16x16xf32>, vector<16x16xf32>, vector<16x108xf32> -> vector<16x256xf32>
    %c0_79 = arith.constant 0 : index
    %c0_80 = arith.constant 0 : index
    %189 = vector.load %arg12[%c0_79, %c0_80] : memref<16x256xf32, #tpu.memory_space<vmem>>, vector<16x256xf32>
    tpu.vector_store %arg12[%c0_79, %c0_80], %188 {strides = array<i32>} : memref<16x256xf32, #tpu.memory_space<vmem>>, vector<16x256xf32>,
    return
  }
  func.func @transform_0(%arg0: i32) -> (i32, i32) {
    %c0_i32 = arith.constant 0 : i32
    %c0_i32_0 = arith.constant 0 : i32
    return %arg0, %c0_i32 : i32, i32
  }
  func.func @transform_1(%arg0: i32) -> (i32, i32) {
    %c0_i32 = arith.constant 0 : i32
    %c0_i32_0 = arith.constant 0 : i32
    return %arg0, %c0_i32 : i32, i32
  }
  func.func @transform_2(%arg0: i32) -> (i32, i32) {
    %c0_i32 = arith.constant 0 : i32
    %c0_i32_0 = arith.constant 0 : i32
    return %arg0, %c0_i32 : i32, i32
  }
  func.func @transform_3(%arg0: i32) -> (i32, i32) {
    %c0_i32 = arith.constant 0 : i32
    %c0_i32_0 = arith.constant 0 : i32
    %c0_i32_1 = arith.constant 0 : i32
    return %c0_i32, %c0_i32_0 : i32, i32
  }
  func.func @transform_4(%arg0: i32) -> (i32, i32) {
    %c0_i32 = arith.constant 0 : i32
    %c0_i32_0 = arith.constant 0 : i32
    %c0_i32_1 = arith.constant 0 : i32
    return %c0_i32, %c0_i32_0 : i32, i32
  }
  func.func @transform_5(%arg0: i32) -> (i32, i32) {
    %c0_i32 = arith.constant 0 : i32
    %c0_i32_0 = arith.constant 0 : i32
    %c0_i32_1 = arith.constant 0 : i32
    return %c0_i32, %c0_i32_0 : i32, i32
  }
  func.func @transform_6(%arg0: i32) -> (i32, i32) {
    %c0_i32 = arith.constant 0 : i32
    %c0_i32_0 = arith.constant 0 : i32
    %c0_i32_1 = arith.constant 0 : i32
    return %c0_i32, %c0_i32_0 : i32, i32
  }
  func.func @transform_7(%arg0: i32) -> (i32, i32) {
    %c0_i32 = arith.constant 0 : i32
    %c0_i32_0 = arith.constant 0 : i32
    %c0_i32_1 = arith.constant 0 : i32
    return %c0_i32, %c0_i32_0 : i32, i32
  }
  func.func @transform_8(%arg0: i32) -> (i32, i32) {
    %c0_i32 = arith.constant 0 : i32
    %c0_i32_0 = arith.constant 0 : i32
    %c0_i32_1 = arith.constant 0 : i32
    return %c0_i32, %c0_i32_0 : i32, i32
  }
  func.func @transform_9(%arg0: i32) -> (i32, i32) {
    %c0_i32 = arith.constant 0 : i32
    %c0_i32_0 = arith.constant 0 : i32
    %c0_i32_1 = arith.constant 0 : i32
    return %c0_i32, %c0_i32_0 : i32, i32
  }
  func.func @transform_10(%arg0: i32) -> (i32, i32) {
    %c0_i32 = arith.constant 0 : i32
    %c0_i32_0 = arith.constant 0 : i32
    %c0_i32_1 = arith.constant 0 : i32
    return %c0_i32, %c0_i32_0 : i32, i32
  }
  func.func @transform_11(%arg0: i32) -> (i32, i32) {
    %c0_i32 = arith.constant 0 : i32
    %c0_i32_0 = arith.constant 0 : i32
    return %arg0, %c0_i32 : i32, i32
  }
}

</mosaic_0001>

<bundles_post_ra>
// kernel: tpu_custom_call.1
= control target key start
LH: loop header
LB: loop body
LE: loop exit
PB: predicated region body
PF: predicated region fallthrough
CT: control target
= control target key end

     0   :  { %s4197_s0 = inlined_call_operand.hbm [shape: f32[32,48], index: 0, kind: input, shape index: {}]   ;;  %s4198_s1 = inlined_call_operand.hbm [shape: f32[32,48], index: 1, kind: input, shape index: {}]   ;;  %s4199_s2 = inlined_call_operand.vmem [shape: s32[32,1], index: 2, kind: input, shape index: {}]   ;;  %s4200_s3 = inlined_call_operand.vmem [shape: f32[48,64], index: 3, kind: input, shape index: {}]   ;;  %s4201_s4 = inlined_call_operand.vmem [shape: f32[64,48], index: 4, kind: input, shape index: {}]   ;;  %s4202_s5 = inlined_call_operand.vmem [shape: f32[48,64], index: 5, kind: input, shape index: {}]   ;;  %s4203_s6 = inlined_call_operand.vmem [shape: f32[4,16], index: 6, kind: input, shape index: {}]   ;;  %s4204_s7 = inlined_call_operand.hbm [shape: f32[16,32], index: 7, kind: input, shape index: {}]   ;;  %s4205_s8 = inlined_call_operand.hbm [shape: f32[16,48], index: 8, kind: input, shape index: {}]   ;;  %s4206_s9 = inlined_call_operand.vmem [shape: f32[48,52], index: 9, kind: input, shape index: {}]   ;;  %s4207_s10 = inlined_call_operand.vmem [shape: f32[1,324], index: 10, kind: input, shape index: {}]   ;;  %s4208_s11 = inlined_call_operand.hbm [shape: f32[32,256], index: 11, kind: output, shape index: {}]  }
   0x1   :  { %4221 = sst [smem:[#allocation22_spill]] %s4197_s0 }
   0x2   :  { %4222 = sst [smem:[#allocation23_spill]] %s4204_s7 }
   0x3   :  { %4223 = sst [smem:[#allocation24_spill]] %s4205_s8 }
   0x4   :  { %4224 = sst [smem:[#allocation25_spill]] %s4208_s11 }
   0x5   :  { %16 = vsyncpa [#allocation3], 0 }
   0x6   :  { %18 = vsyncpa [#allocation3 + $0x1], 0 }
   0x7   :  { %19 = vsyncpa [#allocation6], 0 }
   0x8   :  { %21 = vsyncpa [#allocation6 + $0x1], 0 }
   0x9   :  { %22 = vsyncpa [#allocation9], 0 }
   0xa   :  { %23 = vsyncpa [#allocation4], 0 }
   0xb   :  { %25 = vsyncpa [#allocation4 + $0x1], 0  ;;  %s3402_s17 = smov 0   ;;  %s3404_s18 = smov 0  }
   0xc   :  { %s3406_s19 = smov 0   ;;  %s3408_s20 = smov 0  }
   0xd LB: > { %4225 = sst [smem:[#allocation16_spill]] %s3313_s17  ;;  %s3423_s21 = sadd.s32 4294967295, %s3325_s20   ;;  %s3325_s20 = sphi %s3408_s20, %s4248_s20   ;;  %s3321_s19 = sphi %s3406_s19, %s4250_s19   ;;  %s3317_s18 = sphi %s3404_s18, %s4252_s18   ;;  %s3313_s17 = sphi %s3402_s17, %s4251_s17  }
   0xe   : > { %4226 = sst [smem:[#allocation17_spill]] %s3321_s19  ;;  %s2904_s22 = sadd.s32 4294967294, %s3325_s20  }
   0xf   : > { %p51_p0 = scmp.ne.s32.totalorder %s3317_s18, %s3313_s17  ;;  %p52_p1 = scmp.eq.s32.totalorder %s3423_s21, 0 }
  0x10   : > { %p295_p2 = scmp.eq.s32.totalorder %s3423_s21, 1  ;;  %p301_p3 = scmp.eq.s32.totalorder %s2904_s22, 1 }
  0x11   : > { %p3432_p4 = por %p52_p1, %p51_p0  ;;  %p2905_p5 = scmp.ge.s32.totalorder %s3325_s20, 1 }
  0x12   : > { %p3437_p6 = por %p301_p3, %p51_p0  ;;  %p308_p7 = scmp.lt.s32.totalorder %s3325_s20, 3 }
  0x13   : > { %s4230_s7 = sld [smem:[#allocation23_spill]]  ;;  %s3327_s29 = smov [#allocation7]  }
  0x14   : > { %s4228_s24 = scalar_select %p3437_p6, 1, 0 }
  0x15   : > { %p3445_p8 = pnand %p2905_p5, %p308_p7  ;;  %s333_s30 = sshll.u32 %s3327_s29, 4  ;;  %s334_s30 = int_to_ptr.vmem [resolvable:$true] %s333_s30 }
  0x16   : > { %4229 = sst [smem:[#allocation18_spill]] %s4228_s24  ;;  %s4209_s15 = smov 128  }
  0x17   : > { %p2975_p9 = pneg %p3445_p8  ;;  %s4232_s8 = sld [smem:[#allocation24_spill]] }
  0x18   : > { %s4211_s16 = smov 8   ;;  %s3330_s22 = smov [#allocation8]  }
  0x19   : > { %s331_s27 = sshll.u32 %s4230_s7, 4  ;;  %p2976_p10 = pnand %p2975_p9, %p52_p1  ;;  %s332_s27 = int_to_ptr.hbm [resolvable:$true] %s331_s27 }
  0x1a   : > { %s347_s25 = sshll.u32 %s3330_s22, 4  ;;  %s3464_s26 = sadd.s32 1, %s3325_s20   ;;  %s348_s25 = int_to_ptr.vmem [resolvable:$true] %s347_s25 }
  0x1b   : > { %2978 = dma.hbm_to_vmem [thread:$0]  (!%p2976_p10), %s332_s27, 256, %s334_s30, [#allocation6], %s4209_s15, %s4209_s15, %s4211_s16  }
  0x1c   : > { %4233 = sst [smem:[#allocation19_spill]] %s3464_s26  ;;  %s38_s29 = sadd.s32 1, %s3321_s19 }
  0x1d   : > { %s345_s14 = sshll.u32 %s4232_s8, 4  ;;  %s35_s12 = ssub.s32 %s3325_s20, %s3464_s26  ;;  %s346_s14 = int_to_ptr.hbm [resolvable:$true] %s345_s14 }
  0x1e   : > { %2981 = dma.hbm_to_vmem [thread:$0]  (!%p2976_p10), %s346_s14, 256, %s348_s25, [#allocation9], %s4209_s15, %s4209_s15, %s4211_s16  }
  0x1f   : > { %p45_p12 = scmp.ne.s32.totalorder %s3321_s19, %s3317_s18  ;;  %p36_p13 = scmp.eq.s32.totalorder %s35_s12, 0 }
  0x20   : > { %p46_p0 = scmp.eq.s32.totalorder %s3325_s20, 0  ;;  %p2995_p5 = scmp.lt.s32.totalorder %s3325_s20, 2 }
  0x21   : > { %p3474_p3 = por %p295_p2, %p45_p12  ;;  %s367_s30 = sand.u32 1, %s3321_s19  }
  0x22   : > { %s3480_s27 = scalar_select %p36_p13, %s3321_s19, %s38_s29  }
  0x23   : > { %s4234_s13 = scalar_select %p3474_p3, 1, 0 }
  0x24   : > { %4236 = sst [smem:[#allocation21_spill]] %s3480_s27  ;;  %p47_p7 = por %p46_p0, %p45_p12 }
  0x25   : > { %4235 = sst [smem:[#allocation20_spill]] %s4234_s13  ;;  %s3483_s22 = sshll.u32 %s367_s30, 4 }
  0x26   : > { %s2945_s14 = sshll.u32 %s3325_s20, 4  ;;  %s4237_s0 = sld [smem:[#allocation22_spill]] }
  0x27   : > { %s371_s12 = scalar_lea.vmem [#allocation2], %s3483_s22  ;;  %p3490_p2 = pnand %p2995_p5, %p47_p7 }
  0x28   : > { %s379_s7 = sshll.u32 %s371_s12, 4  ;;  %s398_s19 = scalar_lea.hbm %s4198_s1, %s2945_s14  ;;  %s380_s7 = int_to_ptr.vmem [resolvable:$true] %s379_s7 }
  0x29   : > { %s399_s24 = sshll.u32 %s398_s19, 4  ;;  %s368_s17 = scalar_lea.sflag [#allocation3], %s367_s30  ;;  %s400_s24 = int_to_ptr.hbm [resolvable:$true] %s399_s24 }
  0x2a   : > { %p3191_p10 = pneg %p3490_p2 }
  0x2c   : > { %s376_s16 = scalar_lea.hbm %s4237_s0, %s2945_s14  ;;  %s3194_s12 = scalar_lea.hbm %s4237_s0, 32 }
  0x2d   : > { %s377_s8 = sshll.u32 %s376_s16, 4  ;;  %s378_s8 = int_to_ptr.hbm [resolvable:$true] %s377_s8 }
  0x2e   : > { %s3187_s13 = sshra.s32 %s378_s8, 4  ;;  %s3188_s13 = int_to_ptr.hbm [resolvable:$true] %s3187_s13 }
  0x2f   : > { %s3189_s15 = scalar_lea.hbm %s3188_s13, 16  ;;  %p3195_p0 = scmp.lt.s32.totalorder %s3188_s13, %s4237_s0 }
  0x30   : > { %p3190_p9 = scmp.ne.s32.totalorder %s3188_s13, %s3189_s15  ;;  %p3196_p5 = scmp.lt.s32.totalorder %s3194_s12, %s3189_s15 }
  0x32   : > { %p3192_p12 = pnand %p3191_p10, %p3190_p9  ;;  %p3197_p7 = por %p3196_p5, %p3195_p0 }
  0x34   : > { %p3193_p13 = pneg %p3192_p12 }
  0x36   : > { %p3198_p11 = pnand %p3197_p7, %p3193_p13 }
  0x38   : > { %3201 = shalt.err (!%p3198_p11)
}
  0x39   : > { %s4239_s19 = smov 8   ;;  %s4240_s30 = smov 128  }
  0x3a   : > { %2985 = dma.hbm_to_vmem [thread:$0]  (!%p3490_p2), %s378_s8, 256, %s380_s7, %s368_s17, %s4240_s30, %s4240_s30, %s4239_s19  }
  0x3b   : > { %s393_s14 = scalar_lea.vmem [#allocation5], %s3483_s22  ;;  %s389_s25 = sand.u32 1, %s3325_s20  }
  0x3c   : > { %s401_s16 = sshll.u32 %s393_s14, 4  ;;  %s390_s27 = scalar_lea.sflag [#allocation6], %s389_s25  ;;  %s402_s16 = int_to_ptr.vmem [resolvable:$true] %s401_s16 }
  0x3d   : > { %s3217_s13 = sshra.s32 %s400_s24, 4  ;;  %s3224_s0 = scalar_lea.hbm %s4198_s1, 32  ;;  %s3218_s13 = int_to_ptr.hbm [resolvable:$true] %s3217_s13 }
  0x3e   : > { %s3219_s15 = scalar_lea.hbm %s3218_s13, 16  ;;  %p3225_p13 = scmp.lt.s32.totalorder %s3218_s13, %s4198_s1 }
  0x3f   : > { %p3220_p9 = scmp.ne.s32.totalorder %s3218_s13, %s3219_s15  ;;  %p3226_p0 = scmp.lt.s32.totalorder %s3224_s0, %s3219_s15 }
  0x41   : > { %p3222_p11 = pnand %p3220_p9, %p3191_p10  ;;  %p3227_p5 = por %p3226_p0, %p3225_p13 }
  0x43   : > { %p3223_p12 = pneg %p3222_p11 }
  0x45   : > { %p3228_p7 = pnand %p3227_p5, %p3223_p12 }
  0x47   : > { %3231 = shalt.err (!%p3228_p7)
}
  0x48   : > { %2988 = dma.hbm_to_vmem [thread:$0]  (!%p3490_p2), %s400_s24, 256, %s402_s16, %s390_s27, %s4240_s30, %s4240_s30, %s4239_s19  }
  0x49   : > { %422 = sbr.rel (%p3445_p8) target bundleno = 1406 (0x57e), region = 64  ;;  %s3532_s8 = sand.u32 (!%p3445_p8), 1, %s3317_s18  }
  0x4a   : > { %s2916_s11 = sshll.u32 (!%p3445_p8), %s3532_s8, 4  ;;  %s425_s0 = scalar_lea.sflag (!%p3445_p8), [#allocation3], %s3532_s8 }
  0x4b   : > { %s428_s17 = scalar_lea.vmem (!%p3445_p8), [#allocation2], %s2916_s11 }
  0x4e   : > { %3292 = dma.done.wait (%p3432_p4), %s425_s0, 256  }
  0x4f   : > { %3294 = vsyncadd (%p3432_p4), %s425_s0, 4294967040  ;;  %s434_s24 = sand.u32 1, %s3423_s21   ;;  %s3541_s28 = scalar_lea.vmem [#allocation5], %s2916_s11 }
  0x50   : > { %s435_s26 = scalar_lea.sflag [#allocation6], %s434_s24 }
  0x51   : > { %3296 = dma.done.wait (%p3432_p4), %s435_s26, 256  }
  0x52   : > { %3298 = vsyncadd (%p3432_p4), %s435_s26, 4294967040 }
  0x53   : > { %3300 = dma.done.wait (%p52_p1), [#allocation6], 256  }
  0x54   : > { %3302 = vsyncadd (%p52_p1), [#allocation6], 4294967040 }
  0x55   : > { %3304 = dma.done.wait (%p52_p1), [#allocation9], 256  }
  0x56   : > { %3306 = vsyncadd (%p52_p1), [#allocation9], 4294967040  ;;  %v524_v0 = vld [vmem:[%s4200_s3 + $0x28] sm:$0xff]  ;;  %v523_v1 = vld [vmem:[%s4200_s3 + $0x20] sm:$0xff]  ;;  %vm529_vm0 = vcmask 392192   ;;  %s3331_s0 = smov 64  }
  0x57   : > { %v522_v2 = vld [vmem:[%s4200_s3 + $0x18] sm:$0xff]  ;;  %v3564_v3 = vand.u32 4294901760, %v524_v0  ;;  %v3566_v4 = vand.u32 4294901760, %v523_v1  ;;  %v521_v6 = vld [vmem:[%s4200_s3 + $0x10] sm:$0xff]  ;;  %v520_v7 = vld [vmem:[%s4200_s3 + $0x8] sm:$0xff]  ;;  %s2921_s7 = sshll.u32 %s3423_s21, 1 }
  0x58   : > { %v3568_v5 = vand.u32 4294901760, %v522_v2  ;;  %v519_v8 = vld [vmem:[%s4200_s3] sm:$0xff]  ;;  %v3579_v9 = vand.u32 4294901760, %v521_v6  ;;  %v3581_v10 = vand.u32 4294901760, %v520_v7  ;;  %v508_v13 = vld [vmem:[%s428_s17 + $0x8] sm:$0xff]  ;;  %p501_p1 = scmp.lt.s32.totalorder %s2921_s7, 3 }
  0x59   : > { %v3583_v11 = vand.u32 4294901760, %v519_v8  ;;  %v507_v12 = vld [vmem:[%s428_s17] sm:$0xff]  ;;  %v586_v14 = vsub.f32 %v524_v0, %v3564_v3  ;;  %547 = vmatpush.msra.mxu0 %v3564_v3  ;;  %v592_v15 = vsub.f32 %v523_v1, %v3566_v4  ;;  %680 = vmatpush.msra.mxu3 %v3564_v3  ;;  %v510_v21 = vadd.f32 1.0, %v508_v13  ;;  %v516_v40 = vld [vmem:[%s3541_s28 + $0x8] sm:$0xff]  ;;  %s3333_s24 = smov 16   ;;  %s3335_s22 = smov 80  }
  0x5a   : > { %v3590_v16 = vsub.f32 %v522_v2, %v3568_v5  ;;  %v509_v17 = vadd.f32 1.0, %v507_v12  ;;  %v3593_v18 = vsub.f32 %v521_v6, %v3579_v9  ;;  %v3596_v19 = vsub.f32 %v520_v7, %v3581_v10  ;;  %v515_v36 = vld [vmem:[%s3541_s28] sm:$0xff]  ;;  %v831_v1 = vld [vmem:[%s4201_s4 + $0x38] sm:$0xff]  ;;  %s4254_s7 = smov (!%p501_p1, %s2921_s7), 3  ;;  %s3337_s19 = smov 96  }
  0x5b   : > { %v3599_v20 = vsub.f32 %v519_v8, %v3583_v11  ;;  %642 = vmatpush.msra.mxu2 %v586_v14  ;;  %549 = vmatpush.msra.mxu0 %v3566_v4  ;;  %v587_v22 = vand.u32 4294901760, %v586_v14  ;;  %v593_v23 = vand.u32 4294901760, %v592_v15  ;;  %v3048_v60 = vld [vmem:[%s4207_s10] ss:$0 sm:$0xff]  ;;  %vm835_vm5 = vcmask 523264   ;;  %s2922_s11 = sshll.u32 %s4254_s7, 3 }
  0x5c   : > { %v599_v24 = vand.u32 4294901760, %v3590_v16  ;;  %3051 = vlog2.f32 %v509_v17  ;;  %682 = vmatpush.msra.mxu3 %v3566_v4  ;;  %v605_v25 = vand.u32 4294901760, %v3593_v18  ;;  %v611_v29 = vand.u32 4294901760, %v3596_v19  ;;  %832 = vrot.lane.b32.xlu0 %v3048_v60, %s3331_s0  ;;  %s504_s26 = scalar_lea.vmem %s4199_s2, %s2922_s11  ;;  %s3338_s23 = smov 32  }
  0x5d   : > { %3053 = vlog2.f32 %v510_v21  ;;  %645 = vmatpush.msra.mxu2 %v592_v15  ;;  %v588_v26 = vsub.f32 %v586_v14, %v587_v22  ;;  %551 = vmatpush.msra.mxu0 %v3568_v5  ;;  %v594_v27 = vsub.f32 %v592_v15, %v593_v23  ;;  %v617_v33 = vand.u32 4294901760, %v3599_v20  ;;  %v828_v15 = vld [vmem:[%s4201_s4 + $0x20] sm:$0xff]  ;;  %v827_v21 = vld [vmem:[%s4201_s4 + $0x18] sm:$0xff]  ;;  %s3339_s27 = smov 52   ;;  %s3340_s13 = smov 84  }
  0x5e   : > { %v600_v28 = vsub.f32 %v3590_v16, %v599_v24  ;;  %684 = vmatpush.msra.mxu3 %v3568_v5  ;;  %v606_v32 = vsub.f32 %v3593_v18, %v605_v25  ;;  %v612_v37 = vsub.f32 %v3596_v19, %v611_v29  ;;  %vm1451_vm10 = vcmask 1043456   ;;  %s2920_s14 = sshll.u32 %s3532_s8, 5  ;;  %s2948_s16 = sshll.u32 %s3423_s21, 5 }
  0x5f   : > { %v589_v30 = vand.u32 4294901760, %v588_v26  ;;  %648 = vmatpush.msra.mxu2 %v3590_v16  ;;  %v595_v31 = vand.u32 4294901760, %v594_v27  ;;  %553 = vmatpush.msra.mxu0 %v3579_v9  ;;  %v618_v42 = vsub.f32 %v3599_v20, %v617_v33  ;;  %s2761_s7 = scalar_lea.sflag [#allocation4], %s3532_s8 }
  0x60   : > { %686 = vmatpush.msra.mxu3 %v3579_v9  ;;  %v601_v35 = vand.u32 4294901760, %v600_v28  ;;  %v607_v41 = vand.u32 4294901760, %v606_v32  ;;  %v613_v45 = vand.u32 4294901760, %v612_v37  ;;  %v3690_v28 = vand.u32 4294901760, %v827_v21 }
  0x61   : > { %590 = vmatpush.msra.mxu1 %v589_v30  ;;  %651 = vmatpush.msra.mxu2 %v3593_v18  ;;  %v619_v49 = vand.u32 4294901760, %v618_v42 }
  0x62   : > { %v3052_v34 = vpop.eup %3051  ;;  %555 = vmatpush.msra.mxu0 %v3581_v10  ;;  %688 = vmatpush.msra.mxu3 %v3581_v10  ;;  %v3704_v37 = vsub.f32 %v827_v21, %v3690_v28 }
  0x63   : > { %v3054_v38 = vpop.eup %3053  ;;  %v512_v39 = vmul.f32 0.6931472, %v3052_v34  ;;  %596 = vmatpush.msra.mxu1 %v595_v31  ;;  %654 = vmatpush.msra.mxu2 %v3596_v19 }
  0x64   : > { %v514_v43 = vmul.f32 0.6931472, %v3054_v38  ;;  %557 = vmatpush.msra.mxu0 %v3583_v11  ;;  %690 = vmatpush.msra.mxu3 %v3583_v11  ;;  %v825_v38 = vld [vmem:[%s4201_s4 + $0x8] sm:$0xff] }
  0x65   : > { %v517_v44 = vmul.f32 %v515_v36, %v512_v39  ;;  %602 = vmatpush.msra.mxu1 %v601_v35  ;;  %657 = vmatpush.msra.mxu2 %v3599_v20  ;;  %v3676_v20 = vand.u32 4294901760, %v828_v15  ;;  %v3712_v42 = vand.u32 4294901760, %v825_v38 }
  0x66   : > { %v518_v46 = vmul.f32 %v516_v40, %v514_v43  ;;  %717 = vmatpush.msrb.mxu0 %v587_v22 }
  0x67   : > { %v531_v47 = vsel %vm529_vm0, %v517_v44, 0  ;;  %608 = vmatpush.msra.mxu1 %v607_v41  ;;  %v3688_v27 = vsub.f32 %v828_v15, %v3676_v20 }
  0x68   : > { %v558_v48 = vand.u32 4294901760, %v531_v47  ;;  %v534_v50 = vsel %vm529_vm0, %v518_v46, 0  ;;  %721 = vmatpush.msrb.mxu0 %v593_v23  ;;  %v824_v46 = vld [vmem:[%s4201_s4] sm:$0xff] }
  0x69   : > { %v566_v51 = vand.u32 4294901760, %v534_v50  ;;  %614 = vmatpush.msra.mxu1 %v613_v45  ;;  %v911_v36 = vand.u32 4294901760, %v3688_v27  ;;  %v917_v45 = vand.u32 4294901760, %v3704_v37 }
  0x6a   : > { %v559_v52 = vsub.f32 %v531_v47, %v558_v48  ;;  %725 = vmatpush.msrb.mxu0 %v599_v24 }
  0x6b   : > { %v567_v53 = vsub.f32 %v534_v50, %v566_v51  ;;  %620 = vmatpush.msra.mxu1 %v619_v49  ;;  %v912_v44 = vsub.f32 %v3688_v27, %v911_v36  ;;  %v928_v50 = vsub.f32 %v825_v38, %v3712_v42 }
  0x6c   : > { %660 = vmatmul.f32.vlgmr.msra.gmra.mxu2 %v559_v52  ;;  %v560_v54 = vand.u32 4294901760, %v559_v52  ;;  %622 = vmatmul.f32.vlgmr.msra.gmra.mxu1 %v558_v48 }
  0x6d   : > { %729 = vmatpush.msrb.mxu0 %v605_v25  ;;  %758 = vmatpush.msrb.mxu1 %v3564_v3  ;;  %v568_v56 = vand.u32 4294901760, %v567_v53  ;;  %v3640_v3 = vand.u32 4294901760, %v831_v1 }
  0x6e   : > { %v561_v55 = vsub.f32 %v559_v52, %v560_v54  ;;  %694 = vmatmul.f32.vlgmr.msra.gmra.mxu3 %v560_v54  ;;  %v913_v52 = vand.u32 4294901760, %v912_v44  ;;  %v1423_v44 = vld [vmem:[%s504_s26] sm:$0xff] }
  0x6f   : > { %733 = vmatpush.msrb.mxu0 %v611_v29  ;;  %760 = vmatpush.msrb.mxu1 %v3566_v4  ;;  %v569_v58 = vsub.f32 %v567_v53, %v568_v56  ;;  %v830_v4 = vld [vmem:[%s4201_s4 + $0x30] sm:$0xff]  ;;  %v3646_v6 = vsub.f32 %v831_v1, %v3640_v3 }
  0x70   : > { %v562_v57 = vand.u32 4294901760, %v561_v55  ;;  %v3648_v7 = vand.u32 4294901760, %v830_v4  ;;  %851 = vmatpush.msrb.mxu2 %v3640_v3  ;;  %v826_v29 = vld [vmem:[%s4201_s4 + $0x10] sm:$0xff] }
  0x71   : > { %737 = vmatpush.msrb.mxu0 %v617_v33  ;;  %762 = vmatpush.msrb.mxu1 %v3568_v5  ;;  %v570_v59 = vand.u32 4294901760, %v569_v58  ;;  %v3700_v34 = vand.u32 4294901760, %v826_v29 }
  0x72   : > { %563 = vmatmul.f32.vlgmr.msra.gmra.mxu0 %v562_v57  ;;  %v3657_v12 = vsub.f32 %v830_v4, %v3648_v7  ;;  %853 = vmatpush.msrb.mxu2 %v3648_v7 }
  0x73   : > { %764 = vmatpush.msrb.mxu1 %v3579_v9  ;;  %v829_v9 = vld [vmem:[%s4201_s4 + $0x28] sm:$0xff]  ;;  %958 = vmatpush.msra.mxu0 %v3646_v6  ;;  %v922_v41 = vsub.f32 %v826_v29, %v3700_v34 }
  0x74   : > { %665 = vmatmul.f32.gmra.mxu2 %v567_v53  ;;  %626 = vmatmul.f32.gmra.mxu1 %v566_v51  ;;  %v3660_v13 = vand.u32 4294901760, %v829_v9  ;;  %v899_v18 = vand.u32 4294901760, %v3657_v12  ;;  %v918_v53 = vsub.f32 %v3704_v37, %v917_v45 }
  0x75   : > { %766 = vmatpush.msrb.mxu1 %v3581_v10  ;;  %961 = vmatpush.msra.mxu0 %v3657_v12  ;;  %v923_v49 = vand.u32 4294901760, %v922_v41 }
  0x76   : > { %700 = vmatmul.f32.gmra.mxu3 %v568_v56  ;;  %v3672_v19 = vsub.f32 %v829_v9, %v3660_v13  ;;  %855 = vmatpush.msrb.mxu2 %v3660_v13  ;;  %v900_v23 = vsub.f32 %v3657_v12, %v899_v18  ;;  %v929_v56 = vand.u32 4294901760, %v928_v50 }
  0x77   : > { %768 = vmatpush.msrb.mxu1 %v3583_v11  ;;  %v893_v11 = vand.u32 4294901760, %v3646_v6  ;;  %v924_v55 = vsub.f32 %v922_v41, %v923_v49 }
  0x78   : > { %v905_v24 = vand.u32 4294901760, %v3672_v19  ;;  %964 = vmatpush.msra.mxu0 %v3672_v19  ;;  %857 = vmatpush.msrb.mxu2 %v3676_v20  ;;  %v901_v32 = vand.u32 4294901760, %v900_v23 }
  0x79   : > { %1000 = vmatpush.msra.mxu1 %v3640_v3  ;;  %v894_v17 = vsub.f32 %v3646_v6, %v893_v11 }
  0x7a   : > { %571 = vmatmul.f32.gmra.mxu0 %v570_v59  ;;  %v906_v33 = vsub.f32 %v3672_v19, %v905_v24  ;;  %859 = vmatpush.msrb.mxu2 %v3690_v28  ;;  %v919_v59 = vand.u32 4294901760, %v918_v53 }
  0x7b   : > { %1002 = vmatpush.msra.mxu1 %v3648_v7  ;;  %v895_v22 = vand.u32 4294901760, %v894_v17  ;;  %967 = vmatpush.msra.mxu0 %v3688_v27 }
  0x7c   : > { %770 = vmatmul.f32.vlgmr.msrb.gmra.mxu1 %v558_v48  ;;  %v907_v40 = vand.u32 4294901760, %v906_v33  ;;  %861 = vmatpush.msrb.mxu2 %v3700_v34 }
  0x7d   : > { %1004 = vmatpush.msra.mxu1 %v3660_v13  ;;  %896 = vmatpush.msrb.mxu3 %v895_v22 }
  0x7e   : > { %970 = vmatpush.msra.mxu0 %v3704_v37  ;;  %863 = vmatpush.msrb.mxu2 %v3712_v42 }
  0x7f   : > { %1006 = vmatpush.msra.mxu1 %v3676_v20  ;;  %902 = vmatpush.msrb.mxu3 %v901_v32 }
  0x80   : > { %973 = vmatpush.msra.mxu0 %v922_v41 }
  0x81   : > { %1008 = vmatpush.msra.mxu1 %v3690_v28  ;;  %908 = vmatpush.msrb.mxu3 %v907_v40 }
  0x82   : > { %739 = vmatmul.f32.vlgmr.msrb.gmra.mxu0 %v558_v48 }
  0x83   : > { %1010 = vmatpush.msra.mxu1 %v3700_v34  ;;  %914 = vmatpush.msrb.mxu3 %v913_v52 }
  0x84   : > { %774 = vmatmul.f32.gmra.mxu1 %v566_v51  ;;  %976 = vmatpush.msra.mxu0 %v928_v50 }
  0x85   : > { %1012 = vmatpush.msra.mxu1 %v3712_v42  ;;  %920 = vmatpush.msrb.mxu3 %v919_v59 }
  0x8a   : > { %743 = vmatmul.f32.gmra.mxu0 %v566_v51  ;;  %v3725_v51 = vand.u32 4294901760, %v824_v46 }
  0x8c   : > { %v934_v57 = vsub.f32 %v824_v46, %v3725_v51  ;;  %1014 = vmatpush.msra.mxu1 %v3725_v51  ;;  %865 = vmatpush.msrb.mxu2 %v3725_v51 }
  0x8e   : > { %979 = vmatpush.msra.mxu0 %v934_v57  ;;  %1039 = vmatpush.msra.mxu2 %v893_v11 }
  0x90   : > { %1043 = vmatpush.msra.mxu2 %v899_v18 }
  0x92   : > { %1047 = vmatpush.msra.mxu2 %v905_v24 }
  0x94   : > { %1051 = vmatpush.msra.mxu2 %v911_v36 }
  0x96   : > { %1055 = vmatpush.msra.mxu2 %v917_v45  ;;  %v1424_v45 = vld [vmem:[%s504_s26 + $0x8] sm:$0xff] }
  0x98   : > { %1059 = vmatpush.msra.mxu2 %v923_v49 }
  0x9a   : > { %1063 = vmatpush.msra.mxu2 %v929_v56 }
  0xce   : > { %v833_v59 = vpop.permute.xlu0 %832 }
  0xe9   : > { %v623_v61 = vpop.f32.mrf.mxu1 }
  0xef   : > { %v564_v62 = vpop.f32.mrf.mxu0  ;;  %v661_v2 = vpop.f32.mrf.mxu2 }
  0xf0   : > { %v565_v63 = vadd.f32 %v3048_v60, %v564_v62  ;;  %v930_v62 = vsub.f32 %v928_v50, %v929_v56 }
  0xf1   : > { %v627_v0 = vpop.f32.mrf.mxu1  ;;  %v695_v10 = vpop.f32.mrf.mxu3 }
  0xf2   : > { %v624_v5 = vadd.f32 %v623_v61, %v565_v63  ;;  %v925_v61 = vand.u32 4294901760, %v924_v55  ;;  %v935_v63 = vand.u32 4294901760, %v934_v57  ;;  %v931_v4 = vand.u32 4294901760, %v930_v62 }
  0xf4   : > { %v662_v16 = vadd.f32 %v661_v2, %v624_v5  ;;  %926 = vmatpush.msrb.mxu3 %v925_v61  ;;  %v936_v5 = vsub.f32 %v934_v57, %v935_v63  ;;  %1067 = vmatpush.msra.mxu2 %v935_v63 }
  0xf6   : > { %v696_v30 = vadd.f32 %v695_v10, %v662_v16  ;;  %932 = vmatpush.msrb.mxu3 %v931_v4  ;;  %v937_v9 = vand.u32 4294901760, %v936_v5 }
  0xf7   : > { %v572_v8 = vpop.f32.mrf.mxu0  ;;  %v666_v31 = vpop.f32.mrf.mxu2 }
  0xf8   : > { %v573_v14 = vadd.f32 %v3048_v60, %v572_v8  ;;  %938 = vmatpush.msrb.mxu3 %v937_v9 }
  0xf9   : > { %v771_v26 = vpop.f32.mrf.mxu1  ;;  %v701_v47 = vpop.f32.mrf.mxu3 }
  0xfa   : > { %v628_v25 = vadd.f32 %v627_v0, %v573_v14  ;;  %1086 = vmatpush.msra.mxu3 %v3640_v3 }
  0xfc   : > { %v667_v43 = vadd.f32 %v666_v31, %v628_v25  ;;  %1088 = vmatpush.msra.mxu3 %v3648_v7 }
  0xfe   : > { %v702_v58 = vadd.f32 %v701_v47, %v667_v43  ;;  %1090 = vmatpush.msra.mxu3 %v3660_v13  ;;  %v3332_v47 = vmov 0  }
  0xff   : > { %v740_v35 = vpop.f32.mrf.mxu0  ;;  %3046 = vset.pattern.permute.xlu0 %v3332_v47  ;;  %3047 = vset.pattern.permute.xlu1 %v3332_v47 }
 0x100   : > { %v741_v39 = vadd.f32 %v740_v35, %v696_v30  ;;  %1092 = vmatpush.msra.mxu3 %v3676_v20  ;;  %1426 = vperm.xlu0 %3046, %v1423_v44  }
 0x101   : > { %v775_v1 = vpop.f32.mrf.mxu1  ;;  %1429 = vperm.xlu1 %3047, %v1424_v45  }
 0x102   : > { %v3722_v48 = vadd.f32 %v771_v26, %v741_v39  ;;  %1094 = vmatpush.msra.mxu3 %v3690_v28 }
 0x104   : > { %v778_v54 = vmin.f32 %v3722_v48, 20.0  ;;  %1096 = vmatpush.msra.mxu3 %v3700_v34 }
 0x106   : > { %v780_v60 = vmul.f32 1.442695, %v778_v54  ;;  %1098 = vmatpush.msra.mxu3 %v3712_v42 }
 0x107   : > { %v744_v0 = vpop.f32.mrf.mxu0 }
 0x108   : > { %3055 = vpow2.f32 %v780_v60  ;;  %v745_v2 = vadd.f32 %v744_v0, %v702_v58  ;;  %1100 = vmatpush.msra.mxu3 %v3725_v51 }
 0x10a   : > { %v3737_v8 = vadd.f32 %v775_v1, %v745_v2  ;;  %v1161_v2 = vld [vmem:[%s4202_s5 + $0x28] sm:$0xff] }
 0x10b   : > { %v3763_v4 = vand.u32 4294901760, %v1161_v2 }
 0x10c   : > { %v779_v10 = vmin.f32 %v3737_v8, 20.0 }
 0x10d   : > { %1190 = vmatpush.msrb.mxu0 %v3763_v4 }
 0x10e   : > { %v3056_v14 = vpop.eup %3055  ;;  %v782_v15 = vmul.f32 1.442695, %v779_v10  ;;  %v1229_v10 = vsub.f32 %v1161_v2, %v3763_v4 }
 0x10f   : > { %v784_v6 = vadd.f32 1.0, %v3056_v14 }
 0x110   : > { %3057 = vpow2.f32 %v782_v15 }
 0x111   : > { %v786_v11 = vmul.f32 %v784_v6, %v784_v6  ;;  %v1159_v6 = vld [vmem:[%s4202_s5 + $0x18] sm:$0xff] }
 0x113   : > { %v790_v12 = vadd.f32 1.0, %v786_v11  ;;  %v2923_v26 = vadd.f32 -1.0, %v786_v11  ;;  %v3776_v11 = vand.u32 4294901760, %v1229_v10 }
 0x115   : > { %3059 = vrcp.f32 %v790_v12  ;;  %v803_v20 = vand.u32 2147483648, %v790_v12  ;;  %v801_v22 = vand.u32 2147483647, %v790_v12  ;;  %vm797_vm2 = vweird.f32 %v790_v12 }
 0x116   : > { %v3058_v16 = vpop.eup %3057 }
 0x117   : > { %v785_v3 = vadd.f32 1.0, %v3058_v16  ;;  %v804_v25 = vor.u32 1.1754944e-38, %v803_v20  ;;  %vm802_vm4 = vcmp.eq.f32.partialorder %v801_v22, 8.507059e+37  ;;  %v3780_v16 = vand.u32 4294901760, %v1159_v6 }
 0x119   : > { %v787_v17 = vmul.f32 %v785_v3, %v785_v3 }
 0x11b   : > { %v3060_v7 = vpop.eup %3059  ;;  %v791_v18 = vadd.f32 1.0, %v787_v17  ;;  %v2924_v40 = vadd.f32 -1.0, %v787_v17  ;;  %v1158_v17 = vld [vmem:[%s4202_s5 + $0x10] sm:$0xff] }
 0x11c   : > { %v793_v13 = vmul.f32 %v3060_v7, %v790_v12  ;;  %vm798_vm1 = vweird.f32 %v3060_v7  ;;  %v3791_v22 = vand.u32 4294901760, %v1158_v17 }
 0x11d   : > { %3061 = vrcp.f32 %v791_v18  ;;  %vm799_vm3 = vmor %vm797_vm2, %vm798_vm1  ;;  %v818_v32 = vand.u32 2147483648, %v791_v18  ;;  %v816_v35 = vand.u32 2147483647, %v791_v18  ;;  %vm812_vm7 = vweird.f32 %v791_v18 }
 0x11e   : > { %v794_v19 = vsub.f32 1.0, %v793_v13 }
 0x11f   : > { %v819_v39 = vor.u32 1.1754944e-38, %v818_v32  ;;  %vm817_vm9 = vcmp.eq.f32.partialorder %v816_v35, 8.507059e+37  ;;  %v1156_v32 = vld [vmem:[%s4202_s5] sm:$0xff] }
 0x120   : > { %v795_v21 = vmul.f32 %v3060_v7, %v794_v19  ;;  %v1241_v19 = vsub.f32 %v1159_v6, %v3780_v16 }
 0x122   : > { %v796_v23 = vadd.f32 %v3060_v7, %v795_v21 }
 0x123   : > { %v3062_v24 = vpop.eup %3061 }
 0x124   : > { %v800_v27 = vsel %vm799_vm3, %v3060_v7, %v796_v23  ;;  %v808_v28 = vmul.f32 %v3062_v24, %v791_v18  ;;  %vm813_vm6 = vweird.f32 %v3062_v24  ;;  %v1231_v18 = vsub.f32 %v1229_v10, %v3776_v11  ;;  %v1157_v23 = vld [vmem:[%s4202_s5 + $0x8] sm:$0xff] }
 0x125   : > { %v805_v29 = vsel %vm802_vm4, %v804_v25, %v800_v27  ;;  %vm814_vm8 = vmor %vm812_vm7, %vm813_vm6  ;;  %vm1170_vm7 = vcmask 130048  }
 0x126   : > { %v806_v30 = vmul.f32 %v2923_v26, %v805_v29  ;;  %v809_v31 = vsub.f32 1.0, %v808_v28  ;;  %v1232_v26 = vand.u32 4294901760, %v1231_v18  ;;  %v1242_v28 = vand.u32 4294901760, %v1241_v19 }
 0x128   : > { %v822_v33 = vmul.f32 %v806_v30, %v3722_v48  ;;  %v810_v34 = vmul.f32 %v3062_v24, %v809_v31  ;;  %v1247_v30 = vsub.f32 %v1158_v17, %v3791_v22  ;;  %v3800_v31 = vand.u32 4294901760, %v1157_v23  ;;  %1233 = vmatpush.msrb.mxu1 %v1232_v26 }
 0x129   : > { %v1243_v35 = vsub.f32 %v1241_v19, %v1242_v28 }
 0x12a   : > { %v837_v36 = vsel %vm835_vm5, %v822_v33, 0  ;;  %v811_v37 = vadd.f32 %v3062_v24, %v810_v34 }
 0x12b   : > { %v866_v38 = vand.u32 4294901760, %v837_v36 }
 0x12c   : > { %v815_v41 = vsel %vm814_vm8, %v3062_v24, %v811_v37  ;;  %v1248_v37 = vand.u32 4294901760, %v1247_v30 }
 0x12d   : > { %v867_v42 = vsub.f32 %v837_v36, %v866_v38  ;;  %v820_v43 = vsel %vm817_vm9, %v819_v39, %v815_v41  ;;  %940 = vmatmul.f32.vlgmr.msrb.gmra.mxu3 %v866_v38  ;;  %v3808_v36 = vand.u32 4294901760, %v1156_v32 }
 0x12e   : > { %v821_v46 = vmul.f32 %v2924_v40, %v820_v43  ;;  %1323 = vmatpush.msrb.mxu3 %v3763_v4  ;;  %v1244_v40 = vand.u32 4294901760, %v1243_v35  ;;  %v1249_v43 = vsub.f32 %v1247_v30, %v1248_v37 }
 0x12f   : > { %982 = vmatmul.f32.vlgmr.msra.gmra.mxu0 %v867_v42  ;;  %v868_v48 = vand.u32 4294901760, %v867_v42  ;;  %v1259_v41 = vsub.f32 %v1156_v32, %v3808_v36 }
 0x130   : > { %v823_v49 = vmul.f32 %v821_v46, %v3737_v8  ;;  %v1160_v8 = vld [vmem:[%s4202_s5 + $0x20] sm:$0xff] }
 0x131   : > { %1018 = vmatmul.f32.vlgmr.msra.gmra.mxu1 %v868_v48  ;;  %v869_v50 = vsub.f32 %v867_v42, %v868_v48  ;;  %v3770_v14 = vand.u32 4294901760, %v1160_v8  ;;  %v1260_v47 = vand.u32 4294901760, %v1259_v41 }
 0x132   : > { %v840_v51 = vsel %vm835_vm5, %v823_v49, 0  ;;  %v1250_v49 = vand.u32 4294901760, %v1249_v43  ;;  %vm1444_vm5 = vcmask 31744  }
 0x133   : > { %v874_v52 = vand.u32 4294901760, %v840_v51  ;;  %v870_v53 = vand.u32 4294901760, %v869_v50  ;;  %v1235_v12 = vsub.f32 %v1160_v8, %v3770_v14  ;;  %1325 = vmatpush.msrb.mxu3 %v3770_v14  ;;  %1192 = vmatpush.msrb.mxu0 %v3770_v14  ;;  %v1437_v8 = vld [vmem:[%s4203_s6] sm:$0xf] }
 0x135   : > { %871 = vmatmul.f32.vlgmr.msrb.gmra.mxu2 %v870_v53  ;;  %944 = vmatmul.f32.gmra.mxu3 %v874_v52  ;;  %v875_v54 = vsub.f32 %v840_v51, %v874_v52  ;;  %v3787_v13 = vand.u32 4294901760, %v1235_v12 }
 0x136   : > { %1285 = vmatpush.msrb.mxu2 %v1229_v10  ;;  %1327 = vmatpush.msrb.mxu3 %v3780_v16  ;;  %v1453_v10 = vsel %vm1451_vm10, %v1437_v8, 0 }
 0x137   : > { %987 = vmatmul.f32.gmra.mxu0 %v875_v54  ;;  %v876_v55 = vand.u32 4294901760, %v875_v54  ;;  %v1237_v27 = vsub.f32 %v1235_v12, %v3787_v13 }
 0x138   : > { %1288 = vmatpush.msrb.mxu2 %v1235_v12  ;;  %1194 = vmatpush.msrb.mxu0 %v3780_v16 }
 0x139   : > { %1024 = vmatmul.f32.gmra.mxu1 %v876_v55  ;;  %v877_v56 = vsub.f32 %v875_v54, %v876_v55  ;;  %1329 = vmatpush.msrb.mxu3 %v3791_v22  ;;  %v1238_v34 = vand.u32 4294901760, %v1237_v27 }
 0x13a   : > { %1291 = vmatpush.msrb.mxu2 %v1241_v19  ;;  %1196 = vmatpush.msrb.mxu0 %v3791_v22 }
 0x13b   : > { %v878_v57 = vand.u32 4294901760, %v877_v56  ;;  %1331 = vmatpush.msrb.mxu3 %v3800_v31  ;;  %1239 = vmatpush.msrb.mxu1 %v1238_v34 }
 0x13c   : > { %1294 = vmatpush.msrb.mxu2 %v1247_v30  ;;  %1198 = vmatpush.msrb.mxu0 %v3800_v31 }
 0x13d   : > { %879 = vmatmul.f32.gmra.mxu2 %v878_v57  ;;  %1102 = vmatmul.f32.vlgmr.msra.gmra.mxu3 %v866_v38 }
 0x13e   : > { %1333 = vmatpush.msrb.mxu3 %v3808_v36  ;;  %1245 = vmatpush.msrb.mxu1 %v1244_v40 }
 0x13f   : > { %1200 = vmatpush.msrb.mxu0 %v3808_v36 }
 0x140   : > { %2955 = vmatpush.msra.mxu3 %v3763_v4  ;;  %1251 = vmatpush.msrb.mxu1 %v1250_v49  ;;  %v3334_v49 = vmov 0.0  }
 0x141   : > { %1360 = vmatpush.msra.mxu0 %v3776_v11 }
 0x142   : > { %2956 = vmatpush.msra.mxu3 %v3770_v14 }
 0x143   : > { %1364 = vmatpush.msra.mxu0 %v3787_v13 }
 0x144   : > { %2957 = vmatpush.msra.mxu3 %v3780_v16 }
 0x145   : > { %1069 = vmatmul.f32.vlgmr.msra.gmra.mxu2 %v866_v38  ;;  %1106 = vmatmul.f32.gmra.mxu3 %v874_v52  ;;  %v1253_v38 = vsub.f32 %v1157_v23, %v3800_v31 }
 0x146   : > { %2958 = vmatpush.msra.mxu3 %v3791_v22  ;;  %1368 = vmatpush.msra.mxu0 %v1242_v28 }
 0x147   : > { %v1254_v44 = vand.u32 4294901760, %v1253_v38  ;;  %1297 = vmatpush.msrb.mxu2 %v1253_v38 }
 0x148   : > { %2959 = vmatpush.msra.mxu3 %v3800_v31  ;;  %1372 = vmatpush.msra.mxu0 %v1248_v37 }
 0x149   : > { %v1255_v50 = vsub.f32 %v1253_v38, %v1254_v44  ;;  %1300 = vmatpush.msrb.mxu2 %v1259_v41 }
 0x14a   : > { %2960 = vmatpush.msra.mxu3 %v3808_v36  ;;  %1376 = vmatpush.msra.mxu0 %v1254_v44 }
 0x14b   : > { %2949 = vmatpush.msra.mxu2 %v3776_v11  ;;  %v1256_v54 = vand.u32 4294901760, %v1255_v50 }
 0x14c   : > { %1380 = vmatpush.msra.mxu0 %v1260_v47 }
 0x14d   : > { %1073 = vmatmul.f32.gmra.mxu2 %v874_v52  ;;  %v1261_v52 = vsub.f32 %v1259_v41, %v1260_v47  ;;  %1257 = vmatpush.msrb.mxu1 %v1256_v54 }
 0x14e   : > { %2950 = vmatpush.msra.mxu2 %v3787_v13 }
 0x14f   : > { %v1262_v56 = vand.u32 4294901760, %v1261_v52 }
 0x150   : > { %2951 = vmatpush.msra.mxu2 %v1242_v28 }
 0x151   : > { %1263 = vmatpush.msrb.mxu1 %v1262_v56 }
 0x152   : > { %2952 = vmatpush.msra.mxu2 %v1248_v37 }
 0x153   : > { %1401 = vmatpush.msra.mxu1 %v3763_v4 }
 0x154   : > { %2953 = vmatpush.msra.mxu2 %v1254_v44 }
 0x155   : > { %1403 = vmatpush.msra.mxu1 %v3770_v14 }
 0x156   : > { %2954 = vmatpush.msra.mxu2 %v1260_v47 }
 0x157   : > { %1405 = vmatpush.msra.mxu1 %v3780_v16 }
 0x159   : > { %1407 = vmatpush.msra.mxu1 %v3791_v22 }
 0x15b   : > { %1409 = vmatpush.msra.mxu1 %v3800_v31 }
 0x15d   : > { %1411 = vmatpush.msra.mxu1 %v3808_v36 }
 0x1ac   : > { %v983_v63 = vpop.f32.mrf.mxu0 }
 0x1ae   : > { %v1019_v15 = vpop.f32.mrf.mxu1 }
 0x1b0   : > { %v941_v58 = vpop.f32.mrf.mxu3 }
 0x1b4   : > { %v988_v24 = vpop.f32.mrf.mxu0 }
 0x1b6   : > { %v1025_v42 = vpop.f32.mrf.mxu1 }
 0x1b8   : > { %v872_v60 = vpop.f32.mrf.mxu2  ;;  %v945_v62 = vpop.f32.mrf.mxu3 }
 0x1b9   : > { %v873_v61 = vadd.f32 %v872_v60, %v833_v59 }
 0x1bb   : > { %v942_v0 = vadd.f32 %v941_v58, %v873_v61 }
 0x1bd   : > { %v984_v9 = vadd.f32 %v983_v63, %v942_v0 }
 0x1bf   : > { %v1020_v7 = vadd.f32 %v1019_v15, %v984_v9  ;;  %v3839_v15 = vand.u32 4294901760, %v1453_v10 }
 0x1c0   : > { %v880_v1 = vpop.f32.mrf.mxu2  ;;  %v1103_v20 = vpop.f32.mrf.mxu3 }
 0x1c1   : > { %v881_v5 = vadd.f32 %v880_v1, %v833_v59  ;;  %v3842_v16 = vsub.f32 %v1453_v10, %v3839_v15 }
 0x1c3   : > { %v946_v3 = vadd.f32 %v945_v62, %v881_v5  ;;  %v1506_v22 = vand.u32 4294901760, %v3842_v16 }
 0x1c5   : > { %v989_v29 = vadd.f32 %v988_v24, %v946_v3  ;;  %v1421_v24 = vlaneseq  ;;  %v1507_v30 = vsub.f32 %v3842_v16, %v1506_v22 }
 0x1c7   : > { %v1026_v46 = vadd.f32 %v1025_v42, %v989_v29  ;;  %v1422_v36 = vand.u32 127, %v1421_v24  ;;  %v1508_v42 = vand.u32 4294901760, %v1507_v30 }
 0x1c8   : > { %v1070_v21 = vpop.f32.mrf.mxu2  ;;  %v1107_v53 = vpop.f32.mrf.mxu3 }
 0x1c9   : > { %v1071_v25 = vadd.f32 %v1070_v21, %v1020_v7 }
 0x1cb   : > { %v3806_v33 = vadd.f32 %v1103_v20, %v1071_v25 }
 0x1cd   : > { %v1110_v39 = vmin.f32 %v3806_v33, 20.0 }
 0x1cf   : > { %v1112_v45 = vmul.f32 1.442695, %v1110_v39  ;;  %v1427_v39 = vpop.permute.xlu0 %1426 }
 0x1d0   : > { %v1074_v48 = vpop.f32.mrf.mxu2  ;;  %vm1431_vm4 = vcmp.eq.s32.totalorder %v1422_v36, %v1427_v39 }
 0x1d1   : > { %3063 = vpow2.f32 %v1112_v45  ;;  %v1075_v51 = vadd.f32 %v1074_v48, %v1026_v46  ;;  %v2927_v50 = vsel %vm1431_vm4, 1.0, %v3334_v49 }
 0x1d2   : > { %v1446_v54 = vsel %vm1444_vm5, %v2927_v50, 0 }
 0x1d3   : > { %v3821_v55 = vadd.f32 %v1107_v53, %v1075_v51  ;;  %v1430_v53 = vpop.permute.xlu1 %1429 }
 0x1d4   : > { %vm1432_vm6 = vcmp.eq.s32.totalorder %v1422_v36, %v1430_v53 }
 0x1d5   : > { %v1111_v57 = vmin.f32 %v3821_v55, 20.0 }
 0x1d7   : > { %v3064_v58 = vpop.eup %3063  ;;  %v1114_v59 = vmul.f32 1.442695, %v1111_v57  ;;  %v1473_v57 = vsub.f32 %v1446_v54, %v1446_v54 }
 0x1d8   : > { %v1116_v60 = vadd.f32 1.0, %v3064_v58 }
 0x1d9   : > { %3065 = vpow2.f32 %v1114_v59 }
 0x1da   : > { %v1118_v61 = vmul.f32 %v1116_v60, %v1116_v60  ;;  %v2928_v60 = vsel %vm1432_vm6, 1.0, %v3334_v49 }
 0x1dc   : > { %v1122_v62 = vadd.f32 1.0, %v1118_v61  ;;  %v2925_v7 = vadd.f32 -1.0, %v1118_v61  ;;  %v1474_v61 = vand.u32 4294901760, %v1473_v57 }
 0x1de   : > { %3067 = vrcp.f32 %v1122_v62  ;;  %v1135_v14 = vand.u32 2147483648, %v1122_v62  ;;  %v1133_v11 = vand.u32 2147483647, %v1122_v62  ;;  %vm1129_vm12 = vweird.f32 %v1122_v62 }
 0x1df   : > { %v3066_v63 = vpop.eup %3065 }
 0x1e0   : > { %v1117_v0 = vadd.f32 1.0, %v3066_v63  ;;  %v1136_v17 = vor.u32 1.1754944e-38, %v1135_v14  ;;  %vm1134_vm14 = vcmp.eq.f32.partialorder %v1133_v11, 8.507059e+37 }
 0x1e2   : > { %v1119_v1 = vmul.f32 %v1117_v0, %v1117_v0  ;;  %v1475_v0 = vsub.f32 %v1473_v57, %v1474_v61 }
 0x1e4   : > { %v3068_v2 = vpop.eup %3067  ;;  %v1123_v4 = vadd.f32 1.0, %v1119_v1  ;;  %v2926_v34 = vadd.f32 -1.0, %v1119_v1  ;;  %v1476_v1 = vand.u32 4294901760, %v1475_v0 }
 0x1e5   : > { %v1125_v5 = vmul.f32 %v3068_v2, %v1122_v62  ;;  %vm1130_vm11 = vweird.f32 %v3068_v2  ;;  %v1449_v62 = vsel %vm1444_vm5, %v2928_v60, 0 }
 0x1e6   : > { %3069 = vrcp.f32 %v1123_v4  ;;  %vm1131_vm13 = vmor %vm1129_vm12, %vm1130_vm11  ;;  %v1150_v23 = vand.u32 2147483648, %v1123_v4  ;;  %v1148_v27 = vand.u32 2147483647, %v1123_v4  ;;  %vm1144_vm1 = vweird.f32 %v1123_v4 }
 0x1e7   : > { %v1126_v9 = vsub.f32 1.0, %v1125_v5  ;;  %v1481_v63 = vsub.f32 %v1449_v62, %v1449_v62 }
 0x1e8   : > { %v1151_v31 = vor.u32 1.1754944e-38, %v1150_v23  ;;  %vm1149_vm3 = vcmp.eq.f32.partialorder %v1148_v27, 8.507059e+37 }
 0x1e9   : > { %v1127_v6 = vmul.f32 %v3068_v2, %v1126_v9 }
 0x1eb   : > { %v1128_v12 = vadd.f32 %v3068_v2, %v1127_v6 }
 0x1ec   : > { %v3070_v3 = vpop.eup %3069 }
 0x1ed   : > { %v1132_v18 = vsel %vm1131_vm13, %v3068_v2, %v1128_v12  ;;  %v1140_v13 = vmul.f32 %v3070_v3, %v1123_v4  ;;  %vm1145_vm15 = vweird.f32 %v3070_v3  ;;  %v1482_v2 = vand.u32 4294901760, %v1481_v63 }
 0x1ee   : > { %v1137_v19 = vsel %vm1134_vm14, %v1136_v17, %v1132_v18  ;;  %vm1146_vm2 = vmor %vm1144_vm1, %vm1145_vm15 }
 0x1ef   : > { %v1138_v20 = vmul.f32 %v2925_v7, %v1137_v19  ;;  %v1141_v21 = vsub.f32 1.0, %v1140_v13  ;;  %v1483_v4 = vsub.f32 %v1481_v63, %v1482_v2 }
 0x1f1   : > { %v1154_v25 = vmul.f32 %v1138_v20, %v3806_v33  ;;  %v1142_v26 = vmul.f32 %v3070_v3, %v1141_v21  ;;  %v1162_v33 = vld [vmem:[%s4207_s10] sm:$0x3]  ;;  %v1484_v5 = vand.u32 4294901760, %v1483_v4 }
 0x1f2   : > { %v1164_v40 = vperm.slane %v1162_v33, 0  ;;  %v1165_v51 = vperm.slane %v1162_v33, 1 }
 0x1f3   : > { %v1174_v28 = vsel %vm529_vm0, %v1154_v25, 0  ;;  %v1143_v29 = vadd.f32 %v3070_v3, %v1142_v26 }
 0x1f4   : > { %v1201_v32 = vand.u32 4294901760, %v1174_v28  ;;  %1166 = vrot.lane.b32.xlu2 %v1164_v40, %s3333_s24 }
 0x1f5   : > { %v1147_v35 = vsel %vm1146_vm2, %v3070_v3, %v1143_v29 }
 0x1f6   : > { %v1152_v37 = vsel %vm1149_vm3, %v1151_v31, %v1147_v35  ;;  %1265 = vmatmul.f32.vlgmr.msrb.gmra.mxu1 %v1201_v32  ;;  %v1202_v38 = vsub.f32 %v1174_v28, %v1201_v32 }
 0x1f7   : > { %v1153_v41 = vmul.f32 %v2926_v34, %v1152_v37  ;;  %1564 = vmatpush.msrb.mxu1 %v3839_v15 }
 0x1f8   : > { %1303 = vmatmul.f32.vlgmr.msrb.gmra.mxu2 %v1202_v38  ;;  %v1203_v43 = vand.u32 4294901760, %v1202_v38 }
 0x1f9   : > { %v1155_v44 = vmul.f32 %v1153_v41, %v3821_v55  ;;  %1471 = vmatpush.msrb.mxu2 %v3839_v15  ;;  %v3049_v55 = vld [vmem:[%s4207_s10 + $0x1] ss:$0 sm:$0xff] }
 0x1fa   : > { %1337 = vmatmul.f32.vlgmr.msrb.gmra.mxu3 %v1203_v43  ;;  %v1204_v45 = vsub.f32 %v1202_v38, %v1203_v43  ;;  %1441 = vrot.lane.b32.xlu1 %v3049_v55, %s3335_s22 }
 0x1fb   : > { %v1177_v46 = vsel %vm529_vm0, %v1155_v44, 0  ;;  %1509 = vmatpush.msrb.mxu3 %v1508_v42 }
 0x1fc   : > { %v1205_v47 = vand.u32 4294901760, %v1204_v45  ;;  %v1209_v48 = vand.u32 4294901760, %v1177_v46  ;;  %1168 = vrot.lane.b32.xlu2 %v1165_v51, %s3333_s24 }
 0x1fe   : > { %1206 = vmatmul.f32.vlgmr.msrb.gmra.mxu0 %v1205_v47  ;;  %1269 = vmatmul.f32.gmra.mxu1 %v1209_v48  ;;  %v1210_v52 = vsub.f32 %v1177_v46, %v1209_v48 }
 0x1ff   : > { %1536 = vmatpush.msrb.mxu0 %v3842_v16 }
 0x200   : > { %1308 = vmatmul.f32.gmra.mxu2 %v1210_v52  ;;  %v1211_v56 = vand.u32 4294901760, %v1210_v52 }
 0x202   : > { %1343 = vmatmul.f32.gmra.mxu3 %v1211_v56  ;;  %v1212_v58 = vsub.f32 %v1210_v52, %v1211_v56  ;;  %1680 = vrot.lane.b32.xlu1 %v3049_v55, %s3331_s0  ;;  %s3336_s0 = smov 112  }
 0x204   : > { %v1213_v59 = vand.u32 4294901760, %v1212_v58 }
 0x206   : > { %1214 = vmatmul.f32.gmra.mxu0 %v1213_v59  ;;  %1413 = vmatmul.f32.vlgmr.msra.gmra.mxu1 %v1201_v32 }
 0x208   : > { %1386 = vmatmul.f32.vlgmr.msra.gmra.mxu2 %v1209_v48 }
 0x209   : > { %1596 = vmatpush.msra.mxu2 %v1506_v22 }
 0x20a   : > { %1417 = vmatmul.f32.vlgmr.msra.gmra.mxu3 %v1209_v48 }
 0x20b   : > { %1622 = vmatpush.msra.mxu3 %v3839_v15 }
 0x20e   : > { %1382 = vmatmul.f32.vlgmr.msra.gmra.mxu0 %v1201_v32  ;;  %1568 = vmatmul.f32.vlgmr.msrb.gmra.mxu1 %v1474_v61 }
 0x210   : > { %1477 = vmatmul.f32.vlgmr.msrb.gmra.mxu2 %v1476_v1 }
 0x212   : > { %2929 = vmatmul.msk.f32.vlgmr.msrb.gmra.mxu3 %vm1444_vm5, %v2927_v50 }
 0x216   : > { %1539 = vmatmul.f32.vlgmr.msrb.gmra.mxu0 %v1473_v57  ;;  %1574 = vmatmul.f32.gmra.mxu1 %v1482_v2  ;;  %v1678_v2 = vld [vmem:[#allocation7] sm:$0xff] }
 0x218   : > { %1485 = vmatmul.f32.gmra.mxu2 %v1484_v5 }
 0x21a   : > { %2930 = vmatmul.msk.f32.gmra.mxu3 %vm1444_vm5, %v2928_v60 }
 0x21e   : > { %1544 = vmatmul.f32.gmra.mxu0 %v1481_v63 }
 0x220   : > { %2931 = vmatmul.msk.f32.vlgmr.msra.gmra.mxu2 %vm1444_vm5, %v2927_v50 }
 0x222   : > { %2933 = vmatmul.msk.f32.vlgmr.msra.gmra.mxu3 %vm1444_vm5, %v2927_v50 }
 0x228   : > { %2932 = vmatmul.msk.f32.gmra.mxu2 %vm1444_vm5, %v2928_v60 }
 0x22a   : > { %2934 = vmatmul.msk.f32.gmra.mxu3 %vm1444_vm5, %v2928_v60  ;;  %v1679_v60 = vld [vmem:[#allocation7 + $0x8] sm:$0xff] }
 0x22b   : > { %v3896_v62 = vand.u32 4294901760, %v1679_v60 }
 0x22d   : > { %1704 = vmatpush.msra.mxu0 %v3896_v62  ;;  %1805 = vmatpush.msrb.mxu3 %v3896_v62 }
 0x24e   : > { %v1167_v8 = vpop.permute.xlu2 %1166 }
 0x256   : > { %v1169_v9 = vpop.permute.xlu2 %1168 }
 0x257   : > { %v1171_v14 = vsel %vm1170_vm7, %v1167_v8, %v1169_v9  ;;  %v1739_v8 = vsub.f32 %v1679_v60, %v3896_v62  ;;  %v3903_v9 = vand.u32 4294901760, %v1678_v2 }
 0x259   : > { %1775 = vmatpush.msrb.mxu2 %v1739_v8  ;;  %1706 = vmatpush.msra.mxu0 %v3903_v9 }
 0x25a   : > { %1807 = vmatpush.msrb.mxu3 %v3903_v9 }
 0x26c   : > { %v1442_v37 = vpop.permute.xlu1 %1441 }
 0x273   : > { %v1266_v10 = vpop.f32.mrf.mxu1 }
 0x27b   : > { %v1207_v15 = vpop.f32.mrf.mxu0  ;;  %v1304_v6 = vpop.f32.mrf.mxu2 }
 0x27c   : > { %v1208_v12 = vadd.f32 %v1207_v15, %v1171_v14  ;;  %v1270_v3 = vpop.f32.mrf.mxu1 }
 0x27d   : > { %v1338_v11 = vpop.f32.mrf.mxu3 }
 0x27e   : > { %v1267_v16 = vadd.f32 %v1266_v10, %v1208_v12 }
 0x280   : > { %v1305_v19 = vadd.f32 %v1304_v6, %v1267_v16 }
 0x282   : > { %v1339_v22 = vadd.f32 %v1338_v11, %v1305_v19 }
 0x283   : > { %v1215_v17 = vpop.f32.mrf.mxu0  ;;  %v1309_v18 = vpop.f32.mrf.mxu2 }
 0x284   : > { %v1216_v7 = vadd.f32 %v1215_v17, %v1171_v14  ;;  %v1414_v27 = vpop.f32.mrf.mxu1  ;;  %v1740_v17 = vand.u32 4294901760, %v1739_v8 }
 0x285   : > { %v1344_v13 = vpop.f32.mrf.mxu3 }
 0x286   : > { %v1271_v20 = vadd.f32 %v1270_v3, %v1216_v7  ;;  %v1745_v7 = vsub.f32 %v1678_v2, %v3903_v9  ;;  %1838 = vmatpush.msrb.mxu0 %v1740_v17 }
 0x288   : > { %v1310_v21 = vadd.f32 %v1309_v18, %v1271_v20  ;;  %1778 = vmatpush.msrb.mxu2 %v1745_v7 }
 0x28a   : > { %v1345_v23 = vadd.f32 %v1344_v13, %v1310_v21 }
 0x28b   : > { %v1383_v24 = vpop.f32.mrf.mxu0  ;;  %v1387_v26 = vpop.f32.mrf.mxu2 }
 0x28c   : > { %v1384_v25 = vadd.f32 %v1383_v24, %v1339_v22  ;;  %v1388_v28 = vadd.f32 %v1387_v26, %v1345_v23  ;;  %v1569_v53 = vpop.f32.mrf.mxu1  ;;  %v1741_v23 = vsub.f32 %v1739_v8, %v1740_v17  ;;  %v1746_v24 = vand.u32 4294901760, %v1745_v7 }
 0x28d   : > { %v1418_v29 = vpop.f32.mrf.mxu3 }
 0x28e   : > { %v3876_v30 = vadd.f32 %v1414_v27, %v1384_v25  ;;  %v3878_v31 = vadd.f32 %v1418_v29, %v1388_v28  ;;  %v1742_v29 = vand.u32 4294901760, %v1741_v23  ;;  %1842 = vmatpush.msrb.mxu0 %v1746_v24 }
 0x290   : > { %v1879_v32 = vsub.f32 0.0, %v3876_v30  ;;  %v1880_v34 = vsub.f32 0.0, %v3878_v31  ;;  %1743 = vmatpush.msra.mxu1 %v1742_v29 }
 0x292   : > { %v1881_v35 = vand.u32 2147483647, %v1879_v32  ;;  %v1882_v36 = vand.u32 2147483647, %v1880_v34  ;;  %vm3909_vm8 = vcmp.lt.f32.partialorder %v1879_v32, 0.0  ;;  %v1747_v32 = vsub.f32 %v1745_v7, %v1746_v24 }
 0x293   : > { %v1478_v38 = vpop.f32.mrf.mxu2  ;;  %v1540_v45 = vpop.f32.mrf.mxu0  ;;  %vm1890_vm2 = vcmp.lt.f32.partialorder %v1880_v34, 0.0 }
 0x294   : > { %v1883_v33 = vsub.f32 0.0, %v1881_v35  ;;  %v1884_v39 = vsub.f32 0.0, %v1882_v36  ;;  %v1479_v43 = vadd.f32 %v1478_v38, %v1442_v37  ;;  %v1575_v12 = vpop.f32.mrf.mxu1 }
 0x295   : > { %v1512_v40 = vpop.f32.mrf.mxu3 }
 0x296   : > { %v1885_v41 = vmul.f32 1.442695, %v1883_v33  ;;  %v1887_v42 = vmul.f32 1.442695, %v1884_v39  ;;  %v1513_v44 = vadd.f32 %v1512_v40, %v1479_v43  ;;  %v1748_v39 = vand.u32 4294901760, %v1747_v32 }
 0x298   : > { %3071 = vpow2.f32 %v1885_v41  ;;  %v1541_v51 = vadd.f32 %v1540_v45, %v1513_v44  ;;  %1749 = vmatpush.msra.mxu1 %v1748_v39 }
 0x299   : > { %3073 = vpow2.f32 %v1887_v42 }
 0x29a   : > { %v1570_v56 = vadd.f32 %v1569_v53, %v1541_v51  ;;  %1867 = vmatpush.msrb.mxu1 %v3896_v62 }
 0x29b   : > { %v1486_v46 = vpop.f32.mrf.mxu2  ;;  %v1545_v61 = vpop.f32.mrf.mxu0 }
 0x29c   : > { %v1487_v52 = vadd.f32 %v1486_v46, %v1442_v37  ;;  %1869 = vmatpush.msrb.mxu1 %v3903_v9 }
 0x29d   : > { %v1516_v47 = vpop.f32.mrf.mxu3 }
 0x29e   : > { %v3884_v48 = vpop.eup %3071  ;;  %v1517_v55 = vadd.f32 %v1516_v47, %v1487_v52 }
 0x29f   : > { %v3886_v49 = vpop.eup %3073  ;;  %v3889_v50 = vadd.f32 1e-12, %v3884_v48 }
 0x2a0   : > { %v3892_v54 = vadd.f32 1e-12, %v3886_v49  ;;  %v1546_v0 = vadd.f32 %v1545_v61, %v1517_v55 }
 0x2a1   : > { %3075 = vrcp.f32 %v3889_v50  ;;  %v1902_v11 = vand.u32 2147483647, %v3889_v50  ;;  %v1904_v20 = vand.u32 2147483648, %v3889_v50  ;;  %vm1898_vm11 = vweird.f32 %v3889_v50 }
 0x2a2   : > { %3077 = vrcp.f32 %v3892_v54  ;;  %v1917_v15 = vand.u32 2147483647, %v3892_v54  ;;  %v1919_v16 = vand.u32 2147483648, %v3892_v54  ;;  %v1576_v13 = vadd.f32 %v1575_v12, %v1546_v0 }
 0x2a3   : > { %v1599_v57 = vpop.f32.mrf.mxu2  ;;  %vm1913_vm12 = vweird.f32 %v3892_v54  ;;  %v1905_v33 = vor.u32 1.1754944e-38, %v1904_v20  ;;  %vm1903_vm15 = vcmp.eq.f32.partialorder %v1902_v11, 8.507059e+37 }
 0x2a4   : > { %v1600_v58 = vadd.f32 %v1599_v57, %v1570_v56  ;;  %v1920_v37 = vor.u32 1.1754944e-38, %v1919_v16  ;;  %vm1918_vm1 = vcmp.eq.f32.partialorder %v1917_v15, 8.507059e+37 }
 0x2a5   : > { %v1625_v59 = vpop.f32.mrf.mxu3 }
 0x2a6   : > { %v3898_v1 = vadd.f32 %v1625_v59, %v1600_v58 }
 0x2a7   : > { %v3076_v63 = vpop.eup %3075 }
 0x2a8   : > { %v3078_v4 = vpop.eup %3077  ;;  %v1894_v5 = vmul.f32 %v3076_v63, %v3889_v50  ;;  %v1632_v10 = vmin.f32 %v3898_v1, 20.0  ;;  %vm1899_vm9 = vweird.f32 %v3076_v63 }
 0x2a9   : > { %v1909_v14 = vmul.f32 %v3078_v4, %v3892_v54  ;;  %vm1914_vm10 = vweird.f32 %v3078_v4  ;;  %vm1900_vm13 = vmor %vm1898_vm11, %vm1899_vm9 }
 0x2aa   : > { %v1895_v3 = vsub.f32 1.0, %v1894_v5  ;;  %v1634_v18 = vmul.f32 1.442695, %v1632_v10  ;;  %vm1915_vm14 = vmor %vm1913_vm12, %vm1914_vm10 }
 0x2ab   : > { %v1910_v19 = vsub.f32 1.0, %v1909_v14  ;;  %v1603_v21 = vpop.f32.mrf.mxu2 }
 0x2ac   : > { %v1896_v22 = vmul.f32 %v3076_v63, %v1895_v3  ;;  %3079 = vpow2.f32 %v1634_v18  ;;  %v1604_v25 = vadd.f32 %v1603_v21, %v1576_v13 }
 0x2ad   : > { %v1629_v26 = vpop.f32.mrf.mxu3  ;;  %v1911_v27 = vmul.f32 %v3078_v4, %v1910_v19 }
 0x2ae   : > { %v1897_v28 = vadd.f32 %v3076_v63, %v1896_v22  ;;  %v3920_v35 = vadd.f32 %v1629_v26, %v1604_v25 }
 0x2af   : > { %v1912_v36 = vadd.f32 %v3078_v4, %v1911_v27 }
 0x2b0   : > { %v1901_v38 = vsel %vm1900_vm13, %v3076_v63, %v1897_v28  ;;  %v1633_v40 = vmin.f32 %v3920_v35, 20.0  ;;  %v1681_v28 = vpop.permute.xlu1 %1680 }
 0x2b1   : > { %v1916_v41 = vsel %vm1915_vm14, %v3078_v4, %v1912_v36  ;;  %v1906_v42 = vsel %vm1903_vm15, %v1905_v33, %v1901_v38 }
 0x2b2   : > { %v1921_v43 = vsel %vm1918_vm1, %v1920_v37, %v1916_v41  ;;  %v3930_v44 = vsel %vm3909_vm8, %v3884_v48, %v1906_v42  ;;  %v3080_v45 = vpop.eup %3079  ;;  %v1636_v46 = vmul.f32 1.442695, %v1633_v40 }
 0x2b3   : > { %v3933_v47 = vsel %vm1890_vm2, %v3886_v49, %v1921_v43  ;;  %2015 = vrot.lane.b32.xlu1 %v3930_v44, %s3336_s0  ;;  %1975 = vrot.lane.b32.xlu2 %v3930_v44, %s3337_s19  ;;  %v1638_v34 = vadd.f32 1.0, %v3080_v45 }
 0x2b4   : > { %1977 = vrot.lane.b32.xlu0 %v3933_v47, %s3337_s19  ;;  %3081 = vpow2.f32 %v1636_v46 }
 0x2b5   : > { %v1640_v48 = vmul.f32 %v1638_v34, %v1638_v34 }
 0x2b7   : > { %v1644_v49 = vadd.f32 1.0, %v1640_v48  ;;  %v2935_v63 = vadd.f32 -1.0, %v1640_v48 }
 0x2b9   : > { %3083 = vrcp.f32 %v1644_v49  ;;  %v1657_v57 = vand.u32 2147483648, %v1644_v49  ;;  %v1655_v59 = vand.u32 2147483647, %v1644_v49  ;;  %vm1651_vm4 = vweird.f32 %v1644_v49 }
 0x2ba   : > { %v3082_v50 = vpop.eup %3081 }
 0x2bb   : > { %2017 = vrot.lane.b32.xlu2 %v3933_v47, %s3336_s0  ;;  %v1639_v51 = vadd.f32 1.0, %v3082_v50  ;;  %v1658_v62 = vor.u32 1.1754944e-38, %v1657_v57  ;;  %vm1656_vm8 = vcmp.eq.f32.partialorder %v1655_v59, 8.507059e+37 }
 0x2bd   : > { %v1641_v52 = vmul.f32 %v1639_v51, %v1639_v51 }
 0x2bf   : > { %v3084_v53 = vpop.eup %3083  ;;  %v1645_v54 = vadd.f32 1.0, %v1641_v52  ;;  %v2936_v3 = vadd.f32 -1.0, %v1641_v52 }
 0x2c0   : > { %v1647_v55 = vmul.f32 %v3084_v53, %v1644_v49  ;;  %vm1652_vm3 = vweird.f32 %v3084_v53 }
 0x2c1   : > { %3085 = vrcp.f32 %v1645_v54  ;;  %vm1653_vm6 = vmor %vm1651_vm4, %vm1652_vm3  ;;  %v1672_v9 = vand.u32 2147483648, %v1645_v54  ;;  %v1670_v15 = vand.u32 2147483647, %v1645_v54  ;;  %vm1666_vm10 = vweird.f32 %v1645_v54 }
 0x2c2   : > { %v1648_v56 = vsub.f32 1.0, %v1647_v55 }
 0x2c3   : > { %v1673_v16 = vor.u32 1.1754944e-38, %v1672_v9  ;;  %vm1671_vm12 = vcmp.eq.f32.partialorder %v1670_v15, 8.507059e+37 }
 0x2c4   : > { %v1649_v58 = vmul.f32 %v3084_v53, %v1648_v56  ;;  %v3967_v56 = vld [vmem:[%s4207_s10 + $0x1] sm:$0x3] }
 0x2c5   : > { %v2065_v59 = vperm.slane %v3967_v56, 0 }
 0x2c6   : > { %v1650_v60 = vadd.f32 %v3084_v53, %v1649_v58 }
 0x2c7   : > { %v3086_v61 = vpop.eup %3085 }
 0x2c8   : > { %v1654_v0 = vsel %vm1653_vm6, %v3084_v53, %v1650_v60  ;;  %v1662_v2 = vmul.f32 %v3086_v61, %v1645_v54  ;;  %vm1667_vm9 = vweird.f32 %v3086_v61 }
 0x2c9   : > { %v1659_v4 = vsel %vm1656_vm8, %v1658_v62, %v1654_v0  ;;  %vm1668_vm11 = vmor %vm1666_vm10, %vm1667_vm9 }
 0x2ca   : > { %v1660_v5 = vmul.f32 %v2935_v63, %v1659_v4  ;;  %v1663_v8 = vsub.f32 1.0, %v1662_v2 }
 0x2cc   : > { %v1676_v10 = vmul.f32 %v1660_v5, %v3898_v1  ;;  %v1664_v14 = vmul.f32 %v3086_v61, %v1663_v8 }
 0x2ce   : > { %v1684_v6 = vsel %vm1170_vm7, %v1676_v10, 0  ;;  %v1665_v11 = vadd.f32 %v3086_v61, %v1664_v14 }
 0x2cf   : > { %v1707_v12 = vand.u32 4294901760, %v1684_v6 }
 0x2d0   : > { %v1669_v17 = vsel %vm1668_vm11, %v3086_v61, %v1665_v11 }
 0x2d1   : > { %v1708_v7 = vsub.f32 %v1684_v6, %v1707_v12  ;;  %v1674_v18 = vsel %vm1671_vm12, %v1673_v16, %v1669_v17  ;;  %1751 = vmatmul.f32.vlgmr.msra.gmra.mxu1 %v1707_v12 }
 0x2d2   : > { %v1675_v13 = vmul.f32 %v2936_v3, %v1674_v18 }
 0x2d3   : > { %1781 = vmatmul.f32.vlgmr.msrb.gmra.mxu2 %v1708_v7  ;;  %v1709_v19 = vand.u32 4294901760, %v1708_v7 }
 0x2d4   : > { %v1677_v1 = vmul.f32 %v1675_v13, %v3920_v35 }
 0x2d5   : > { %1811 = vmatmul.f32.vlgmr.msrb.gmra.mxu3 %v1709_v19  ;;  %v1710_v20 = vsub.f32 %v1708_v7, %v1709_v19  ;;  %v3975_v19 = vadd.f32 1.0, %v3930_v44 }
 0x2d6   : > { %v1687_v21 = vsel %vm1170_vm7, %v1677_v1, 0 }
 0x2d7   : > { %v1715_v22 = vand.u32 4294901760, %v1687_v21  ;;  %v1711_v23 = vand.u32 4294901760, %v1710_v20 }
 0x2d9   : > { %1712 = vmatmul.f32.vlgmr.msra.gmra.mxu0 %v1711_v23  ;;  %1755 = vmatmul.f32.gmra.mxu1 %v1715_v22  ;;  %v1716_v24 = vsub.f32 %v1687_v21, %v1715_v22 }
 0x2db   : > { %1786 = vmatmul.f32.gmra.mxu2 %v1716_v24  ;;  %v1717_v25 = vand.u32 4294901760, %v1716_v24 }
 0x2dd   : > { %1817 = vmatmul.f32.gmra.mxu3 %v1717_v25  ;;  %v1718_v26 = vsub.f32 %v1716_v24, %v1717_v25 }
 0x2df   : > { %v1719_v27 = vand.u32 4294901760, %v1718_v26 }
 0x2e1   : > { %1720 = vmatmul.f32.gmra.mxu0 %v1719_v27  ;;  %1871 = vmatmul.f32.vlgmr.msrb.gmra.mxu1 %v1707_v12 }
 0x2e9   : > { %1844 = vmatmul.f32.vlgmr.msrb.gmra.mxu0 %v1707_v12  ;;  %1875 = vmatmul.f32.gmra.mxu1 %v1715_v22 }
 0x2f1   : > { %1848 = vmatmul.f32.gmra.mxu0 %v1715_v22 }
 0x30d   : > { %v3949_v29 = vpop.permute.xlu2 %1975 }
 0x30e   : > { %v1981_v22 = vadd.f32 %v3949_v29, %v3975_v19 }
 0x315   : > { %v2018_v36 = vpop.permute.xlu2 %2017 }
 0x316   : > { %v3957_v33 = vmul.f32 %v2018_v36, %v3878_v31 }
 0x325   : > { %v2016_v32 = vpop.permute.xlu1 %2015 }
 0x326   : > { %v3952_v35 = vmul.f32 %v2016_v32, %v3876_v30  ;;  %v1978_v36 = vpop.permute.xlu0 %1977 }
 0x328   : > { %2025 = vrot.lane.b32.xlu0 %v3952_v35, %s3337_s19 }
 0x330   : > { %2027 = vrot.lane.b32.xlu0 %v3957_v33, %s3337_s19 }
 0x338   : > { %2067 = vrot.lane.b32.xlu0 %v2065_v59, %s3338_s23 }
 0x34e   : > { %v1752_v37 = vpop.f32.mrf.mxu1 }
 0x356   : > { %v1713_v38 = vpop.f32.mrf.mxu0  ;;  %v1756_v40 = vpop.f32.mrf.mxu1 }
 0x357   : > { %v1714_v39 = vadd.f32 %v1713_v38, %v1681_v28  ;;  %v1782_v42 = vpop.f32.mrf.mxu2 }
 0x358   : > { %v1812_v46 = vpop.f32.mrf.mxu3 }
 0x359   : > { %v1753_v41 = vadd.f32 %v1752_v37, %v1714_v39  ;;  %v3987_v37 = vadd.f32 1.0, %v3933_v47 }
 0x35b   : > { %v1783_v45 = vadd.f32 %v1782_v42, %v1753_v41 }
 0x35d   : > { %v1813_v34 = vadd.f32 %v1812_v46, %v1783_v45 }
 0x35e   : > { %v1721_v43 = vpop.f32.mrf.mxu0  ;;  %v1872_v49 = vpop.f32.mrf.mxu1 }
 0x35f   : > { %v1722_v30 = vadd.f32 %v1721_v43, %v1681_v28  ;;  %v1787_v31 = vpop.f32.mrf.mxu2 }
 0x360   : > { %v1818_v55 = vpop.f32.mrf.mxu3 }
 0x361   : > { %v1757_v48 = vadd.f32 %v1756_v40, %v1722_v30  ;;  %v1982_v40 = vadd.f32 %v1978_v36, %v3987_v37 }
 0x363   : > { %v1788_v52 = vadd.f32 %v1787_v31, %v1757_v48 }
 0x365   : > { %v1819_v57 = vadd.f32 %v1818_v55, %v1788_v52 }
 0x366   : > { %v1845_v50 = vpop.f32.mrf.mxu0  ;;  %v1876_v63 = vpop.f32.mrf.mxu1 }
 0x367   : > { %v1846_v51 = vadd.f32 %v1845_v50, %v1813_v34  ;;  %v2066_v50 = vperm.slane %v3967_v56, 1 }
 0x369   : > { %v3961_v53 = vadd.f32 %v1872_v49, %v1846_v51 }
 0x36b   : > { %v1925_v54 = vsub.f32 0.0, %v3961_v53 }
 0x36d   : > { %v1927_v58 = vand.u32 2147483647, %v1925_v54  ;;  %vm1935_vm2 = vcmp.lt.f32.partialorder %v1925_v54, 0.0 }
 0x36e   : > { %v1849_v60 = vpop.f32.mrf.mxu0 }
 0x36f   : > { %v1929_v61 = vsub.f32 0.0, %v1927_v58  ;;  %v1850_v62 = vadd.f32 %v1849_v60, %v1819_v57 }
 0x371   : > { %v1931_v0 = vmul.f32 1.442695, %v1929_v61  ;;  %v3971_v2 = vadd.f32 %v1876_v63, %v1850_v62 }
 0x373   : > { %3087 = vpow2.f32 %v1931_v0  ;;  %v1926_v4 = vsub.f32 0.0, %v3971_v2 }
 0x375   : > { %v1928_v5 = vand.u32 2147483647, %v1926_v4  ;;  %vm1936_vm9 = vcmp.lt.f32.partialorder %v1926_v4, 0.0 }
 0x377   : > { %v1930_v8 = vsub.f32 0.0, %v1928_v5 }
 0x379   : > { %v3088_v9 = vpop.eup %3087  ;;  %v1933_v10 = vmul.f32 1.442695, %v1930_v8 }
 0x37a   : > { %v1937_v14 = vadd.f32 1e-12, %v3088_v9 }
 0x37b   : > { %3089 = vpow2.f32 %v1933_v10 }
 0x37c   : > { %3091 = vrcp.f32 %v1937_v14  ;;  %v1950_v3 = vand.u32 2147483648, %v1937_v14  ;;  %v1948_v7 = vand.u32 2147483647, %v1937_v14  ;;  %vm1944_vm14 = vweird.f32 %v1937_v14 }
 0x37e   : > { %v1951_v1 = vor.u32 1.1754944e-38, %v1950_v3  ;;  %vm1949_vm1 = vcmp.eq.f32.partialorder %v1948_v7, 8.507059e+37  ;;  %v2061_v3 = vld [vmem:[#allocation8] sm:$0xff] }
 0x37f   : > { %v2096_v7 = vand.u32 4294901760, %v2061_v3 }
 0x381   : > { %v3090_v15 = vpop.eup %3089 }
 0x382   : > { %v3092_v6 = vpop.eup %3091  ;;  %v1938_v11 = vadd.f32 1e-12, %v3090_v15 }
 0x383   : > { %v1940_v12 = vmul.f32 %v3092_v6, %v1937_v14  ;;  %vm1945_vm13 = vweird.f32 %v3092_v6 }
 0x384   : > { %3093 = vrcp.f32 %v1938_v11  ;;  %vm1946_vm15 = vmor %vm1944_vm14, %vm1945_vm13  ;;  %v1965_v27 = vand.u32 2147483648, %v1938_v11  ;;  %v1963_v32 = vand.u32 2147483647, %v1938_v11  ;;  %vm1959_vm4 = vweird.f32 %v1938_v11 }
 0x385   : > { %v1941_v16 = vsub.f32 1.0, %v1940_v12  ;;  %v2062_v12 = vld [vmem:[#allocation8 + $0x8] sm:$0xff] }
 0x386   : > { %v1966_v38 = vor.u32 1.1754944e-38, %v1965_v27  ;;  %vm1964_vm8 = vcmp.eq.f32.partialorder %v1963_v32, 8.507059e+37 }
 0x387   : > { %v1942_v17 = vmul.f32 %v3092_v6, %v1941_v16  ;;  %v2094_v16 = vand.u32 4294901760, %v2062_v12 }
 0x389   : > { %v1943_v18 = vadd.f32 %v3092_v6, %v1942_v17  ;;  %2095 = vmatpush.msra.mxu2 %v2094_v16  ;;  %v2130_v17 = vsub.f32 %v2062_v12, %v2094_v16  ;;  %2196 = vmatpush.msra.mxu1 %v2094_v16 }
 0x38a   : > { %v3094_v13 = vpop.eup %3093 }
 0x38b   : > { %v1947_v20 = vsel %vm1946_vm15, %v3092_v6, %v1943_v18  ;;  %v1955_v21 = vmul.f32 %v3094_v13, %v1938_v11  ;;  %vm1960_vm3 = vweird.f32 %v3094_v13  ;;  %v2131_v18 = vand.u32 4294901760, %v2130_v17  ;;  %2166 = vmatpush.msra.mxu0 %v2130_v17  ;;  %2097 = vmatpush.msra.mxu2 %v2096_v7 }
 0x38c   : > { %v1952_v23 = vsel %vm1949_vm1, %v1951_v1, %v1947_v20  ;;  %vm1961_vm6 = vmor %vm1959_vm4, %vm1960_vm3  ;;  %2198 = vmatpush.msra.mxu1 %v2096_v7 }
 0x38d   : > { %v3979_v24 = vsel %vm1935_vm2, %v3088_v9, %v1952_v23  ;;  %v1956_v25 = vsub.f32 1.0, %v1955_v21  ;;  %v2132_v1 = vsub.f32 %v2130_v17, %v2131_v18  ;;  %2229 = vmatpush.msrb.mxu2 %v2131_v18 }
 0x38e   : > { %2035 = vrot.lane.b32.xlu1 %v3979_v24, %s3336_s0  ;;  %v1983_v26 = vadd.f32 %v1981_v22, %v3979_v24  ;;  %v2576_v44 = vadd.f32 %v3975_v19, %v3979_v24 }
 0x38f   : > { %v1957_v28 = vmul.f32 %v3094_v13, %v1956_v25  ;;  %v2133_v21 = vand.u32 4294901760, %v2132_v1 }
 0x390   : > { %3095 = vrcp.f32 %v1983_v26  ;;  %v1996_v49 = vand.u32 2147483648, %v1983_v26  ;;  %v2589_v51 = vand.u32 2147483648, %v2576_v44  ;;  %v1994_v52 = vand.u32 2147483647, %v1983_v26 }
 0x391   : > { %3097 = vrcp.f32 %v2576_v44  ;;  %v1958_v29 = vadd.f32 %v3094_v13, %v1957_v28  ;;  %v2587_v55 = vand.u32 2147483647, %v2576_v44  ;;  %vm1990_vm12 = vweird.f32 %v1983_v26  ;;  %2134 = vmatpush.msra.mxu3 %v2133_v21 }
 0x392   : > { %vm2583_vm13 = vweird.f32 %v2576_v44  ;;  %v1997_v60 = vor.u32 1.1754944e-38, %v1996_v49  ;;  %v2590_v61 = vor.u32 1.1754944e-38, %v2589_v51  ;;  %vm1995_vm1 = vcmp.eq.f32.partialorder %v1994_v52, 8.507059e+37 }
 0x393   : > { %v1962_v39 = vsel %vm1961_vm6, %v3094_v13, %v1958_v29  ;;  %vm2588_vm2 = vcmp.eq.f32.partialorder %v2587_v55, 8.507059e+37  ;;  %v2136_v13 = vsub.f32 %v2061_v3, %v2096_v7 }
 0x394   : > { %v1967_v41 = vsel %vm1964_vm8, %v1966_v38, %v1962_v39 }
 0x395   : > { %v3990_v42 = vsel %vm1936_vm9, %v3090_v15, %v1967_v41  ;;  %v2137_v20 = vand.u32 4294901760, %v2136_v13  ;;  %2169 = vmatpush.msra.mxu0 %v2136_v13 }
 0x396   : > { %v3096_v43 = vpop.eup %3095  ;;  %v1984_v45 = vadd.f32 %v1982_v40, %v3990_v42  ;;  %2037 = vrot.lane.b32.xlu1 %v3990_v42, %s3336_s0  ;;  %2628 = vrot.lane.b32.xlu0 %v3990_v42, %s3338_s23 }
 0x397   : > { %v3098_v47 = vpop.eup %3097  ;;  %v1986_v30 = vmul.f32 %v3096_v43, %v1983_v26  ;;  %vm1991_vm10 = vweird.f32 %v3096_v43  ;;  %v2138_v22 = vsub.f32 %v2136_v13, %v2137_v20  ;;  %2233 = vmatpush.msrb.mxu2 %v2137_v20 }
 0x398   : > { %3099 = vrcp.f32 %v1984_v45  ;;  %v2579_v46 = vmul.f32 %v3098_v47, %v2576_v44  ;;  %vm2584_vm11 = vweird.f32 %v3098_v47  ;;  %vm1992_vm14 = vmor %vm1990_vm12, %vm1991_vm10  ;;  %v2011_v8 = vand.u32 2147483648, %v1984_v45 }
 0x399   : > { %v1987_v34 = vsub.f32 1.0, %v1986_v30  ;;  %vm2585_vm15 = vmor %vm2583_vm13, %vm2584_vm11  ;;  %v2009_v10 = vand.u32 2147483647, %v1984_v45  ;;  %vm2005_vm4 = vweird.f32 %v1984_v45  ;;  %v2139_v23 = vand.u32 4294901760, %v2138_v22 }
 0x39a   : > { %v2580_v48 = vsub.f32 1.0, %v2579_v46  ;;  %v2012_v15 = vor.u32 1.1754944e-38, %v2011_v8  ;;  %v2026_v25 = vpop.permute.xlu0 %2025 }
 0x39b   : > { %v1988_v31 = vmul.f32 %v3096_v43, %v1987_v34  ;;  %vm2010_vm8 = vcmp.eq.f32.partialorder %v2009_v10, 8.507059e+37  ;;  %2140 = vmatpush.msra.mxu3 %v2139_v23  ;;  %v2031_v39 = vadd.f32 %v2026_v25, %v3952_v35 }
 0x39c   : > { %v2581_v54 = vmul.f32 %v3098_v47, %v2580_v48 }
 0x39d   : > { %v1989_v57 = vadd.f32 %v3096_v43, %v1988_v31  ;;  %2258 = vmatpush.msrb.mxu3 %v2094_v16 }
 0x39e   : > { %v3100_v58 = vpop.eup %3099  ;;  %v2582_v59 = vadd.f32 %v3098_v47, %v2581_v54  ;;  %2069 = vrot.lane.b32.xlu1 %v2066_v50, %s3338_s23 }
 0x39f   : > { %v1993_v62 = vsel %vm1992_vm14, %v3096_v43, %v1989_v57  ;;  %v2001_v56 = vmul.f32 %v3100_v58, %v1984_v45  ;;  %vm2006_vm3 = vweird.f32 %v3100_v58  ;;  %2260 = vmatpush.msrb.mxu3 %v2096_v7 }
 0x3a0   : > { %v2586_v63 = vsel %vm2585_vm15, %v3098_v47, %v2582_v59  ;;  %v3999_v0 = vsel %vm1995_vm1, %v1997_v60, %v1993_v62  ;;  %vm2007_vm6 = vmor %vm2005_vm4, %vm2006_vm3 }
 0x3a1   : > { %v4001_v4 = vsel %vm2588_vm2, %v2590_v61, %v2586_v63  ;;  %2047 = vrot.lane.b32.xlu2 %v3999_v0, %s3336_s0  ;;  %v2002_v5 = vsub.f32 1.0, %v2001_v56  ;;  %v2055_v51 = vadd.f32 1e-12, %v3999_v0  ;;  %v3050_v56 = vld [vmem:[%s4207_s10 + $0x2] ss:$0 sm:$0xff] }
 0x3a2   : > { %2612 = vrot.lane.b32.xlu0 %v4001_v4, %s3336_s0  ;;  %v2028_v44 = vpop.permute.xlu0 %2027 }
 0x3a3   : > { %v2003_v9 = vmul.f32 %v3100_v58, %v2002_v5  ;;  %v2032_v31 = vadd.f32 %v2028_v44, %v3957_v33 }
 0x3a5   : > { %v2004_v14 = vadd.f32 %v3100_v58, %v2003_v9 }
 0x3a7   : > { %v2008_v6 = vsel %vm2007_vm6, %v3100_v58, %v2004_v14  ;;  %vm2071_vm6 = vcmask 261120  }
 0x3a8   : > { %v4007_v11 = vsel %vm2010_vm8, %v2012_v15, %v2008_v6 }
 0x3a9   : > { %2049 = vrot.lane.b32.xlu2 %v4007_v11, %s3336_s0 }
 0x3aa   : > { %v4015_v36 = vpop.permute.xlu0 %2067 }
 0x3b1   : > { %2626 = vrot.lane.b32.xlu2 %v3979_v24, %s3338_s23  ;;  %v2577_v24 = vadd.f32 %v3987_v37, %v3990_v42 }
 0x3b3   : > { %3101 = vrcp.f32 %v2577_v24  ;;  %v2602_v45 = vand.u32 2147483647, %v2577_v24  ;;  %v2604_v47 = vand.u32 2147483648, %v2577_v24  ;;  %vm2598_vm10 = vweird.f32 %v2577_v24 }
 0x3b5   : > { %vm2603_vm12 = vcmp.eq.f32.partialorder %v2602_v45, 8.507059e+37  ;;  %v2605_v50 = vor.u32 1.1754944e-38, %v2604_v47 }
 0x3b9   : > { %v3102_v26 = vpop.eup %3101 }
 0x3ba   : > { %v2594_v27 = vmul.f32 %v3102_v26, %v2577_v24  ;;  %vm2599_vm9 = vweird.f32 %v3102_v26 }
 0x3bb   : > { %vm2600_vm11 = vmor %vm2598_vm10, %vm2599_vm9 }
 0x3bc   : > { %v2595_v32 = vsub.f32 1.0, %v2594_v27 }
 0x3be   : > { %v2596_v29 = vmul.f32 %v3102_v26, %v2595_v32 }
 0x3c0   : > { %v2597_v43 = vadd.f32 %v3102_v26, %v2596_v29 }
 0x3c2   : > { %v2601_v34 = vsel %vm2600_vm11, %v3102_v26, %v2597_v43  ;;  %v2620_v43 = vadd.f32 1e-12, %v4001_v4 }
 0x3c3   : > { %v2606_v55 = vsel %vm2603_vm12, %v2605_v50, %v2601_v34 }
 0x3c4   : > { %v2621_v27 = vadd.f32 1e-12, %v2606_v55 }
 0x3fb   : > { %v2048_v28 = vpop.permute.xlu2 %2047 }
 0x400   : > { %v2036_v38 = vpop.permute.xlu1 %2035 }
 0x401   : > { %v4019_v40 = vmul.f32 %v2036_v38, %v3961_v53  ;;  %v2056_v38 = vadd.f32 1e-12, %v4007_v11 }
 0x403   : > { %v2043_v41 = vadd.f32 %v4019_v40, %v2031_v39  ;;  %2666 = vrot.lane.b32.xlu1 %v4019_v40, %s3338_s23  ;;  %v2050_v42 = vpop.permute.xlu2 %2049  ;;  %v2608_v39 = vadd.f32 %v4019_v40, %v3952_v35 }
 0x405   : > { %v4024_v30 = vmul.f32 %v2048_v28, %v2043_v41 }
 0x407   : > { %v2075_v46 = vsel %vm1170_vm7, %v4024_v30, 0 }
 0x408   : > { %v2038_v53 = vpop.permute.xlu1 %2037  ;;  %v2629_v48 = vpop.permute.xlu0 %2628  ;;  %v4028_v49 = vand.u32 4294901760, %v2075_v46 }
 0x409   : > { %v4033_v52 = vmul.f32 %v2038_v53, %v3971_v2  ;;  %v2633_v54 = vadd.f32 %v2629_v48, %v3987_v37 }
 0x40a   : > { %2142 = vmatmul.f32.vlgmr.msra.gmra.mxu3 %v4028_v49  ;;  %v2099_v57 = vsub.f32 %v2075_v46, %v4028_v49 }
 0x40b   : > { %v2044_v58 = vadd.f32 %v4033_v52, %v2032_v31  ;;  %3103 = vrcp.f32 %v2633_v54  ;;  %2614 = vrot.lane.b32.xlu1 %v2606_v55, %s3336_s0  ;;  %2668 = vrot.lane.b32.xlu2 %v4033_v52, %s3338_s23  ;;  %v2627_v59 = vpop.permute.xlu2 %2626  ;;  %v2660_v6 = vand.u32 2147483648, %v2633_v54  ;;  %v2658_v17 = vand.u32 2147483647, %v2633_v54  ;;  %s4144_s23 = scalar_lea.vmem [#allocation10], %s2920_s14 }
 0x40c   : > { %v2632_v60 = vadd.f32 %v2627_v59, %v3975_v19  ;;  %2172 = vmatmul.f32.vlgmr.msra.gmra.mxu0 %v2099_v57  ;;  %v2100_v2 = vand.u32 4294901760, %v2099_v57  ;;  %3105 = vlog2.f32 %v2055_v51  ;;  %vm2654_vm13 = vweird.f32 %v2633_v54  ;;  %s2774_s29 = sshll.u32 %s4144_s23, 4  ;;  %s2775_s29 = int_to_ptr.vmem [resolvable:$true] %s2774_s29 }
 0x40d   : > { %v4043_v37 = vmul.f32 %v2050_v42, %v2044_v58  ;;  %v2661_v21 = vor.u32 1.1754944e-38, %v2660_v6  ;;  %vm2659_vm1 = vcmp.eq.f32.partialorder %v2658_v17, 8.507059e+37  ;;  %v2609_v50 = vadd.f32 %v4033_v52, %v3957_v33 }
 0x40e   : > { %3107 = vrcp.f32 %v2632_v60  ;;  %2202 = vmatmul.f32.vlgmr.msra.gmra.mxu1 %v2100_v2  ;;  %v2101_v61 = vsub.f32 %v2099_v57, %v2100_v2  ;;  %v2645_v20 = vand.u32 2147483648, %v2632_v60  ;;  %v2643_v23 = vand.u32 2147483647, %v2632_v60 }
 0x40f   : > { %v2078_v62 = vsel %vm1170_vm7, %v4043_v37, 0  ;;  %vm2639_vm2 = vweird.f32 %v2632_v60  ;;  %3109 = vlog2.f32 %v2621_v27 }
 0x410   : > { %v2102_v63 = vand.u32 4294901760, %v2101_v61  ;;  %v2106_v0 = vand.u32 4294901760, %v2078_v62  ;;  %v2646_v44 = vor.u32 1.1754944e-38, %v2645_v20  ;;  %vm2644_vm4 = vcmp.eq.f32.partialorder %v2643_v23, 8.507059e+37 }
 0x411   : > { %v3104_v5 = vpop.eup %3103  ;;  %3111 = vlog2.f32 %v2056_v38 }
 0x412   : > { %2103 = vmatmul.f32.vlgmr.msra.gmra.mxu2 %v2102_v63  ;;  %2146 = vmatmul.f32.gmra.mxu3 %v2106_v0  ;;  %v2107_v19 = vsub.f32 %v2078_v62, %v2106_v0  ;;  %v2650_v8 = vmul.f32 %v3104_v5, %v2633_v54  ;;  %v3106_v9 = vpop.eup %3105  ;;  %vm2655_vm7 = vweird.f32 %v3104_v5  ;;  %3113 = vlog2.f32 %v2620_v43  ;;  %v2316_v43 = vld [vmem:[%s4206_s9] sm:$0xff] }
 0x413   : > { %2325 = vrot.lane.b32.xlu1 %v3050_v56, %s3336_s0  ;;  %v2058_v7 = vmul.f32 0.6931472, %v3106_v9  ;;  %vm2656_vm14 = vmor %vm2654_vm13, %vm2655_vm7 }
 0x414   : > { %v3108_v10 = vpop.eup %3107  ;;  %2177 = vmatmul.f32.gmra.mxu0 %v2107_v19  ;;  %v2108_v14 = vand.u32 4294901760, %v2107_v19  ;;  %v2651_v15 = vsub.f32 1.0, %v2650_v8  ;;  %v2613_v29 = vpop.permute.xlu0 %2612 }
 0x415   : > { %v2635_v12 = vmul.f32 %v3108_v10, %v2632_v60  ;;  %vm2640_vm15 = vweird.f32 %v3108_v10  ;;  %v2618_v41 = vmul.f32 %v2613_v29, %v2608_v39  ;;  %v3110_v42 = vpop.eup %3109 }
 0x416   : > { %2208 = vmatmul.f32.gmra.mxu1 %v2108_v14  ;;  %v2109_v16 = vsub.f32 %v2107_v19, %v2108_v14  ;;  %v2652_v3 = vmul.f32 %v3104_v5, %v2651_v15  ;;  %vm2641_vm3 = vmor %vm2639_vm2, %vm2640_vm15  ;;  %v2625_v11 = vmul.f32 0.6931472, %v3110_v42  ;;  %v2320_v15 = vld [vmem:[%s4206_s9 + $0x20] sm:$0xff]  ;;  %vm2739_vm15 = vcmask 556032  }
 0x417   : > { %v2636_v18 = vsub.f32 1.0, %v2635_v12  ;;  %v3112_v45 = vpop.eup %3111  ;;  %v4089_v6 = vand.u32 4294901760, %v2320_v15  ;;  %vm2745_vm2 = vcmask 818176  }
 0x418   : > { %v2110_v13 = vand.u32 4294901760, %v2109_v16  ;;  %v2653_v1 = vadd.f32 %v3104_v5, %v2652_v3  ;;  %v2060_v47 = vmul.f32 0.6931472, %v3112_v45  ;;  %v3114_v46 = vpop.eup %3113  ;;  %v2319_v3 = vld [vmem:[%s4206_s9 + $0x18] sm:$0xff] }
 0x419   : > { %v2637_v22 = vmul.f32 %v3108_v10, %v2636_v18  ;;  %v2623_v34 = vmul.f32 0.6931472, %v3114_v46  ;;  %v2354_v46 = vand.u32 4294901760, %v2316_v43 }
 0x41a   : > { %2111 = vmatmul.f32.gmra.mxu2 %v2110_v13  ;;  %2262 = vmatmul.f32.vlgmr.msrb.gmra.mxu3 %v4028_v49  ;;  %v2657_v24 = vsel %vm2656_vm14, %v3104_v5, %v2653_v1  ;;  %v4098_v13 = vsub.f32 %v2320_v15, %v4089_v6  ;;  %v4101_v1 = vand.u32 4294901760, %v2319_v3 }
 0x41b   : > { %2698 = vrot.lane.b32.xlu1 %v2058_v7, %s3339_s27  ;;  %v2662_v25 = vsel %vm2659_vm1, %v2661_v21, %v2657_v24  ;;  %v2638_v26 = vadd.f32 %v3108_v10, %v2637_v22  ;;  %v2318_v21 = vld [vmem:[%s4206_s9 + $0x10] sm:$0xff]  ;;  %vm2742_vm1 = vcmask 687104  }
 0x41c   : > { %2678 = vrot.lane.b32.xlu0 %v2662_v25, %s3336_s0  ;;  %v2685_v54 = vadd.f32 1e-12, %v2662_v25  ;;  %v2391_v24 = vand.u32 4294901760, %v4098_v13  ;;  %v2396_v25 = vsub.f32 %v2319_v3, %v4101_v1 }
 0x41d   : > { %v2642_v28 = vsel %vm2641_vm3, %v3108_v10, %v2638_v26  ;;  %v4112_v26 = vand.u32 4294901760, %v2318_v21  ;;  %vm2748_vm3 = vcmask 949248  }
 0x41e   : > { %v2647_v32 = vsel %vm2644_vm4, %v2646_v44, %v2642_v28  ;;  %v2317_v28 = vld [vmem:[%s4206_s9 + $0x8] sm:$0xff]  ;;  %v2392_v29 = vsub.f32 %v4098_v13, %v2391_v24  ;;  %v2397_v38 = vand.u32 4294901760, %v2396_v25 }
 0x41f   : > { %2676 = vrot.lane.b32.xlu2 %v2647_v32, %s3336_s0  ;;  %v2684_v40 = vadd.f32 1e-12, %v2647_v32  ;;  %v2402_v39 = vsub.f32 %v2318_v21, %v4112_v26  ;;  %v2352_v42 = vand.u32 4294901760, %v2317_v28 }
 0x421   : > { %3115 = vlog2.f32 %v2684_v40  ;;  %v2398_v40 = vsub.f32 %v2396_v25, %v2397_v38 }
 0x422   : > { %2235 = vmatmul.f32.vlgmr.msrb.gmra.mxu2 %v4028_v49  ;;  %2266 = vmatmul.f32.gmra.mxu3 %v2106_v0  ;;  %3117 = vlog2.f32 %v2685_v54 }
 0x424   : > { %2706 = vrot.lane.b32.xlu0 %v2618_v41, %s3340_s13 }
 0x427   : > { %2690 = vrot.lane.b32.xlu2 %v4024_v30, %s3339_s27  ;;  %v3116_v53 = vpop.eup %3115  ;;  %v2070_v30 = vpop.permute.xlu1 %2069 }
 0x428   : > { %v2687_v4 = vmul.f32 0.6931472, %v3116_v53  ;;  %v3118_v59 = vpop.eup %3117  ;;  %v2072_v56 = vsel %vm2071_vm6, %v4015_v36, %v2070_v30 }
 0x42a   : > { %2239 = vmatmul.f32.gmra.mxu2 %v2106_v0 }
 0x42c   : > { %2716 = vrot.lane.b32.xlu0 %v2625_v11, %s3340_s13  ;;  %v2393_v11 = vand.u32 4294901760, %v2392_v29 }
 0x42f   : > { %2700 = vrot.lane.b32.xlu2 %v2060_v47, %s3339_s27  ;;  %v2403_v47 = vand.u32 4294901760, %v2402_v39 }
 0x434   : > { %2692 = vrot.lane.b32.xlu0 %v4043_v37, %s3339_s27  ;;  %v2689_v37 = vmul.f32 0.6931472, %v3118_v59 }
 0x437   : > { %2714 = vrot.lane.b32.xlu2 %v2623_v34, %s3340_s13 }
 0x43c   : > { %2730 = vrot.lane.b32.xlu0 %v2687_v4, %s3340_s13  ;;  %v2408_v4 = vsub.f32 %v2317_v28, %v2352_v42 }
 0x465   : > { %v2669_v49 = vpop.permute.xlu2 %2668 }
 0x466   : > { %v2673_v60 = vadd.f32 %v2669_v49, %v3957_v33  ;;  %v2321_v33 = vld [vmem:[%s4206_s9 + $0x28] sm:$0xff]  ;;  %v2404_v49 = vsub.f32 %v2402_v39, %v2403_v47 }
 0x467   : > { %v4081_v14 = vand.u32 4294901760, %v2321_v33 }
 0x469   : > { %v4087_v36 = vsub.f32 %v2321_v33, %v4081_v14  ;;  %2345 = vmatpush.msrb.mxu0 %v4081_v14  ;;  %2478 = vmatpush.msra.mxu3 %v4081_v14 }
 0x46b   : > { %v2385_v18 = vand.u32 4294901760, %v4087_v36  ;;  %2440 = vmatpush.msra.mxu2 %v4087_v36  ;;  %2347 = vmatpush.msrb.mxu0 %v4089_v6 }
 0x46c   : > { %2480 = vmatpush.msra.mxu3 %v4089_v6 }
 0x46d   : > { %v2386_v23 = vsub.f32 %v4087_v36, %v2385_v18  ;;  %2443 = vmatpush.msra.mxu2 %v4098_v13  ;;  %2349 = vmatpush.msrb.mxu0 %v4101_v1 }
 0x46e   : > { %2482 = vmatpush.msra.mxu3 %v4101_v1 }
 0x46f   : > { %v2387_v32 = vand.u32 4294901760, %v2386_v23  ;;  %2446 = vmatpush.msra.mxu2 %v2396_v25  ;;  %2351 = vmatpush.msrb.mxu0 %v4112_v26 }
 0x470   : > { %2484 = vmatpush.msra.mxu3 %v4112_v26 }
 0x471   : > { %2388 = vmatpush.msrb.mxu1 %v2387_v32  ;;  %2449 = vmatpush.msra.mxu2 %v2402_v39 }
 0x472   : > { %2486 = vmatpush.msra.mxu3 %v2352_v42  ;;  %2353 = vmatpush.msrb.mxu0 %v2352_v42 }
 0x473   : > { %2394 = vmatpush.msrb.mxu1 %v2393_v11  ;;  %2452 = vmatpush.msra.mxu2 %v2408_v4 }
 0x474   : > { %2488 = vmatpush.msra.mxu3 %v2354_v46  ;;  %2355 = vmatpush.msrb.mxu0 %v2354_v46 }
 0x475   : > { %v2667_v48 = vpop.permute.xlu1 %2666 }
 0x476   : > { %v2672_v57 = vadd.f32 %v2667_v48, %v3952_v35  ;;  %v2399_v48 = vand.u32 4294901760, %v2398_v40  ;;  %2515 = vmatpush.msra.mxu0 %v2385_v18 }
 0x478   : > { %2400 = vmatpush.msrb.mxu1 %v2399_v48  ;;  %2519 = vmatpush.msra.mxu0 %v2391_v24 }
 0x479   : > { %v2677_v55 = vpop.permute.xlu2 %2676 }
 0x47a   : > { %v2682_v58 = vmul.f32 %v2677_v55, %v2672_v57  ;;  %v2405_v55 = vand.u32 4294901760, %v2404_v49  ;;  %2523 = vmatpush.msra.mxu0 %v2397_v38 }
 0x47c   : > { %2406 = vmatpush.msrb.mxu1 %v2405_v55  ;;  %2527 = vmatpush.msra.mxu0 %v2403_v47 }
 0x47d   : > { %v2615_v51 = vpop.permute.xlu1 %2614 }
 0x47e   : > { %v2619_v31 = vmul.f32 %v2615_v51, %v2609_v50  ;;  %v2414_v50 = vsub.f32 %v2316_v43, %v2354_v46 }
 0x480   : > { %2708 = vrot.lane.b32.xlu1 %v2619_v31, %s3340_s13  ;;  %v2409_v31 = vand.u32 4294901760, %v2408_v4  ;;  %v2415_v57 = vand.u32 4294901760, %v2414_v50  ;;  %2455 = vmatpush.msra.mxu2 %v2414_v50 }
 0x482   : > { %v2410_v59 = vsub.f32 %v2408_v4, %v2409_v31  ;;  %2531 = vmatpush.msra.mxu0 %v2409_v31 }
 0x484   : > { %2535 = vmatpush.msra.mxu0 %v2415_v57 }
 0x488   : > { %2722 = vrot.lane.b32.xlu1 %v2682_v58, %s3340_s13 }
 0x489   : > { %v2173_v5 = vpop.f32.mrf.mxu0 }
 0x48b   : > { %v2203_v10 = vpop.f32.mrf.mxu1 }
 0x48d   : > { %v2143_v52 = vpop.f32.mrf.mxu3 }
 0x48e   : > { %v2679_v2 = vpop.permute.xlu0 %2678 }
 0x48f   : > { %v2683_v61 = vmul.f32 %v2679_v2, %v2673_v60  ;;  %v2416_v60 = vsub.f32 %v2414_v50, %v2415_v57 }
 0x490   : > { %2732 = vrot.lane.b32.xlu1 %v2689_v37, %s3340_s13  ;;  %v2411_v37 = vand.u32 4294901760, %v2410_v59 }
 0x491   : > { %2724 = vrot.lane.b32.xlu2 %v2683_v61, %s3340_s13  ;;  %v2178_v22 = vpop.f32.mrf.mxu0  ;;  %v2417_v61 = vand.u32 4294901760, %v2416_v60  ;;  %s4243_s13 = sld [smem:[#allocation25_spill]] }
 0x492   : > { %2412 = vmatpush.msrb.mxu1 %v2411_v37 }
 0x493   : > { %v2209_v45 = vpop.f32.mrf.mxu1 }
 0x494   : > { %2418 = vmatpush.msrb.mxu1 %v2417_v61 }
 0x495   : > { %v2104_v62 = vpop.f32.mrf.mxu2  ;;  %v2147_v63 = vpop.f32.mrf.mxu3 }
 0x496   : > { %v2105_v35 = vadd.f32 %v2104_v62, %v2072_v56  ;;  %2556 = vmatpush.msra.mxu1 %v4081_v14  ;;  %v2707_v47 = vpop.permute.xlu0 %2706 }
 0x497   : > { %s2773_s15 = scalar_lea.hbm %s4243_s13, %s2948_s16  ;;  %s3267_s22 = scalar_lea.hbm %s4243_s13, 64 }
 0x498   : > { %v2144_v0 = vadd.f32 %v2143_v52, %v2105_v35  ;;  %2558 = vmatpush.msra.mxu1 %v4089_v6  ;;  %s2776_s21 = sshll.u32 %s2773_s15, 4  ;;  %s2777_s21 = int_to_ptr.hbm [resolvable:$true] %s2776_s21 }
 0x499   : > { %s3261_s11 = sshra.s32 %s2777_s21, 4  ;;  %s3262_s11 = int_to_ptr.hbm [resolvable:$true] %s3261_s11 }
 0x49a   : > { %v2174_v9 = vadd.f32 %v2173_v5, %v2144_v0  ;;  %2560 = vmatpush.msra.mxu1 %v4101_v1  ;;  %s3263_s17 = scalar_lea.hbm %s3262_s11, 32  ;;  %p3268_p10 = scmp.lt.s32.totalorder %s3262_s11, %s4243_s13 }
 0x49b   : > { %p3264_p4 = scmp.ne.s32.totalorder %s3262_s11, %s3263_s17  ;;  %p3269_p9 = scmp.lt.s32.totalorder %s3267_s22, %s3263_s17 }
 0x49c   : > { %v2204_v16 = vadd.f32 %v2203_v10, %v2174_v9  ;;  %2562 = vmatpush.msra.mxu1 %v4112_v26 }
 0x49d   : > { %v2112_v19 = vpop.f32.mrf.mxu2  ;;  %v2263_v17 = vpop.f32.mrf.mxu3  ;;  %p3265_p8 = pnand %p3264_p4, %p3474_p3  ;;  %p3270_p11 = por %p3269_p9, %p3268_p10 }
 0x49e   : > { %v2113_v8 = vadd.f32 %v2112_v19, %v2072_v56  ;;  %2564 = vmatpush.msra.mxu1 %v2352_v42  ;;  %v4140_v48 = vpop.permute.xlu0 %2716 }
 0x49f   : > { %p3266_p2 = pneg %p3265_p8 }
 0x4a0   : > { %v2148_v12 = vadd.f32 %v2147_v63, %v2113_v8  ;;  %2566 = vmatpush.msra.mxu1 %v2354_v46 }
 0x4a1   : > { %p3271_p12 = pnand %p3270_p11, %p3266_p2 }
 0x4a2   : > { %v2179_v27 = vadd.f32 %v2178_v22, %v2148_v12 }
 0x4a4   : > { %v2210_v53 = vadd.f32 %v2209_v45, %v2179_v27 }
 0x4a5   : > { %v2236_v7 = vpop.f32.mrf.mxu2  ;;  %v2267_v54 = vpop.f32.mrf.mxu3 }
 0x4a6   : > { %v2237_v20 = vadd.f32 %v2236_v7, %v2204_v16 }
 0x4a8   : > { %v4115_v44 = vadd.f32 %v2263_v17, %v2237_v20 }
 0x4aa   : > { %v2270_v41 = vmin.f32 %v4115_v44, 20.0 }
 0x4ac   : > { %v2272_v34 = vmul.f32 1.442695, %v2270_v41 }
 0x4ad   : > { %v2240_v30 = vpop.f32.mrf.mxu2 }
 0x4ae   : > { %3119 = vpow2.f32 %v2272_v34  ;;  %v2241_v51 = vadd.f32 %v2240_v30, %v2210_v53  ;;  %v2326_v53 = vpop.permute.xlu1 %2325  ;;  %v2691_v30 = vpop.permute.xlu2 %2690 }
 0x4b0   : > { %v4129_v58 = vadd.f32 %v2267_v54, %v2241_v51  ;;  %v2693_v51 = vpop.permute.xlu0 %2692 }
 0x4b2   : > { %v2271_v2 = vmin.f32 %v4129_v58, 20.0 }
 0x4b4   : > { %v3120_v52 = vpop.eup %3119  ;;  %v2274_v62 = vmul.f32 1.442695, %v2271_v2 }
 0x4b5   : > { %v2276_v56 = vadd.f32 1.0, %v3120_v52 }
 0x4b6   : > { %3121 = vpow2.f32 %v2274_v62  ;;  %v2699_v49 = vpop.permute.xlu1 %2698  ;;  %v2701_v50 = vpop.permute.xlu2 %2700 }
 0x4b7   : > { %v2278_v35 = vmul.f32 %v2276_v56, %v2276_v56 }
 0x4b8   : > { %v2731_v55 = vpop.permute.xlu0 %2730 }
 0x4b9   : > { %v2282_v63 = vadd.f32 1.0, %v2278_v35  ;;  %v2937_v3 = vadd.f32 -1.0, %v2278_v35 }
 0x4bb   : > { %3123 = vrcp.f32 %v2282_v63  ;;  %v2295_v14 = vand.u32 2147483648, %v2282_v63  ;;  %v2293_v36 = vand.u32 2147483647, %v2282_v63  ;;  %vm2289_vm9 = vweird.f32 %v2282_v63 }
 0x4bc   : > { %v3122_v0 = vpop.eup %3121 }
 0x4bd   : > { %v2277_v5 = vadd.f32 1.0, %v3122_v0  ;;  %v2296_v16 = vor.u32 1.1754944e-38, %v2295_v14  ;;  %vm2294_vm11 = vcmp.eq.f32.partialorder %v2293_v36, 8.507059e+37 }
 0x4be   : > { %v2715_v54 = vpop.permute.xlu2 %2714 }
 0x4bf   : > { %v2279_v19 = vmul.f32 %v2277_v5, %v2277_v5 }
 0x4c1   : > { %v3124_v8 = vpop.eup %3123  ;;  %v2283_v9 = vadd.f32 1.0, %v2279_v19  ;;  %v2938_v28 = vadd.f32 -1.0, %v2279_v19 }
 0x4c2   : > { %v2285_v33 = vmul.f32 %v3124_v8, %v2282_v63  ;;  %vm2290_vm8 = vweird.f32 %v3124_v8 }
 0x4c3   : > { %3125 = vrcp.f32 %v2283_v9  ;;  %vm2291_vm10 = vmor %vm2289_vm9, %vm2290_vm8  ;;  %v2310_v20 = vand.u32 2147483648, %v2283_v9  ;;  %v2308_v23 = vand.u32 2147483647, %v2283_v9  ;;  %vm2304_vm7 = vweird.f32 %v2283_v9 }
 0x4c4   : > { %v2286_v10 = vsub.f32 1.0, %v2285_v33 }
 0x4c5   : > { %v2311_v26 = vor.u32 1.1754944e-38, %v2310_v20  ;;  %vm2309_vm14 = vcmp.eq.f32.partialorder %v2308_v23, 8.507059e+37 }
 0x4c6   : > { %v2287_v15 = vmul.f32 %v3124_v8, %v2286_v10 }
 0x4c8   : > { %v2288_v6 = vadd.f32 %v3124_v8, %v2287_v15 }
 0x4c9   : > { %v3126_v12 = vpop.eup %3125 }
 0x4ca   : > { %v2292_v17 = vsel %vm2291_vm10, %v3124_v8, %v2288_v6  ;;  %v2300_v7 = vmul.f32 %v3126_v12, %v2283_v9  ;;  %vm2305_vm12 = vweird.f32 %v3126_v12 }
 0x4cb   : > { %v2297_v18 = vsel %vm2294_vm11, %v2296_v16, %v2292_v17  ;;  %vm2306_vm13 = vmor %vm2304_vm7, %vm2305_vm12 }
 0x4cc   : > { %v2298_v13 = vmul.f32 %v2937_v3, %v2297_v18  ;;  %v2301_v1 = vsub.f32 1.0, %v2300_v7 }
 0x4ce   : > { %v2314_v21 = vmul.f32 %v2298_v13, %v4115_v44  ;;  %v2302_v22 = vmul.f32 %v3126_v12, %v2301_v1 }
 0x4d0   : > { %v2329_v24 = vsel %vm529_vm0, %v2314_v21, 0  ;;  %v2303_v25 = vadd.f32 %v3126_v12, %v2302_v22 }
 0x4d1   : > { %v2356_v27 = vand.u32 4294901760, %v2329_v24 }
 0x4d2   : > { %v2307_v32 = vsel %vm2306_vm13, %v3126_v12, %v2303_v25 }
 0x4d3   : > { %v2312_v29 = vsel %vm2309_vm14, %v2311_v26, %v2307_v32  ;;  %2420 = vmatmul.f32.vlgmr.msrb.gmra.mxu1 %v2356_v27  ;;  %v2357_v38 = vsub.f32 %v2329_v24, %v2356_v27 }
 0x4d4   : > { %v2313_v39 = vmul.f32 %v2938_v28, %v2312_v29 }
 0x4d5   : > { %2458 = vmatmul.f32.vlgmr.msra.gmra.mxu2 %v2357_v38  ;;  %v2358_v41 = vand.u32 4294901760, %v2357_v38 }
 0x4d6   : > { %v2315_v44 = vmul.f32 %v2313_v39, %v4129_v58 }
 0x4d7   : > { %2492 = vmatmul.f32.vlgmr.msra.gmra.mxu3 %v2358_v41  ;;  %v2359_v42 = vsub.f32 %v2357_v38, %v2358_v41 }
 0x4d8   : > { %v2332_v43 = vsel %vm529_vm0, %v2315_v44, 0  ;;  %vm2753_vm0 = vcmask 162816  }
 0x4d9   : > { %v2360_v45 = vand.u32 4294901760, %v2359_v42  ;;  %v2364_v11 = vand.u32 4294901760, %v2332_v43 }
 0x4db   : > { %2361 = vmatmul.f32.vlgmr.msrb.gmra.mxu0 %v2360_v45  ;;  %2424 = vmatmul.f32.gmra.mxu1 %v2364_v11  ;;  %v2365_v40 = vsub.f32 %v2332_v43, %v2364_v11 }
 0x4dd   : > { %2463 = vmatmul.f32.gmra.mxu2 %v2365_v40  ;;  %v2366_v46 = vand.u32 4294901760, %v2365_v40 }
 0x4df   : > { %2498 = vmatmul.f32.gmra.mxu3 %v2366_v46  ;;  %v2367_v34 = vsub.f32 %v2365_v40, %v2366_v46 }
 0x4e1   : > { %v2368_v4 = vand.u32 4294901760, %v2367_v34 }
 0x4e3   : > { %2369 = vmatmul.f32.gmra.mxu0 %v2368_v4  ;;  %2568 = vmatmul.f32.vlgmr.msra.gmra.mxu1 %v2356_v27 }
 0x4eb   : > { %2537 = vmatmul.f32.vlgmr.msra.gmra.mxu0 %v2356_v27  ;;  %2572 = vmatmul.f32.gmra.mxu1 %v2364_v11  ;;  %v2725_v60 = vpop.permute.xlu2 %2724 }
 0x4f2   : > { %v2709_v31 = vpop.permute.xlu1 %2708 }
 0x4f3   : > { %2541 = vmatmul.f32.gmra.mxu0 %v2364_v11 }
 0x4fa   : > { %v2723_v57 = vpop.permute.xlu1 %2722 }
 0x4fb   : > { %v2751_v58 = vsel %vm1444_vm5, %v2723_v57, %v2731_v55 }
 0x4fc   : > { %v2754_v59 = vsel %vm2753_vm0, %v2751_v58, 0.0 }
 0x4fd   : > { %2757 = vst [vmem:[%s4144_s23 + $0x8] sm:$0xff] %v2754_v59 }
 0x502   : > { %v2733_v2 = vpop.permute.xlu1 %2732 }
 0x503   : > { %v2752_v37 = vsel %vm1444_vm5, %v2725_v60, %v2733_v2  ;;  %vm2736_vm5 = vcmask 424960  }
 0x504   : > { %v2755_v61 = vsel %vm2753_vm0, %v2752_v37, 0.0 }
 0x505   : > { %2759 = vst [vmem:[%s4144_s23 + $0x18] sm:$0xff] %v2755_v61 }
 0x550   : > { %v2421_v52 = vpop.f32.mrf.mxu1 }
 0x558   : > { %v2362_v62 = vpop.f32.mrf.mxu0  ;;  %v2425_v35 = vpop.f32.mrf.mxu1 }
 0x559   : > { %v2363_v56 = vadd.f32 %v2362_v62, %v2326_v53  ;;  %v2459_v0 = vpop.f32.mrf.mxu2 }
 0x55a   : > { %v2493_v9 = vpop.f32.mrf.mxu3 }
 0x55b   : > { %v2422_v63 = vadd.f32 %v2421_v52, %v2363_v56 }
 0x55d   : > { %v2460_v19 = vadd.f32 %v2459_v0, %v2422_v63 }
 0x55f   : > { %v2494_v33 = vadd.f32 %v2493_v9, %v2460_v19 }
 0x560   : > { %v2370_v5 = vpop.f32.mrf.mxu0  ;;  %v2569_v14 = vpop.f32.mrf.mxu1 }
 0x561   : > { %v2371_v8 = vadd.f32 %v2370_v5, %v2326_v53  ;;  %v2464_v6 = vpop.f32.mrf.mxu2 }
 0x562   : > { %v2499_v17 = vpop.f32.mrf.mxu3 }
 0x563   : > { %v2426_v10 = vadd.f32 %v2425_v35, %v2371_v8 }
 0x565   : > { %v2465_v12 = vadd.f32 %v2464_v6, %v2426_v10 }
 0x567   : > { %v2500_v18 = vadd.f32 %v2499_v17, %v2465_v12 }
 0x568   : > { %v2538_v15 = vpop.f32.mrf.mxu0  ;;  %v2573_v23 = vpop.f32.mrf.mxu1 }
 0x569   : > { %v2539_v36 = vadd.f32 %v2538_v15, %v2494_v33 }
 0x56b   : > { %v2570_v16 = vadd.f32 %v2569_v14, %v2539_v36 }
 0x56d   : > { %v2737_v3 = vsel %vm2736_vm5, %v2570_v16, %v2691_v30 }
 0x56e   : > { %v2740_v7 = vsel %vm2739_vm15, %v2737_v3, %v2699_v49 }
 0x56f   : > { %v2743_v13 = vsel %vm2742_vm1, %v2740_v7, %v2707_v47 }
 0x570   : > { %v2746_v1 = vsel %vm2745_vm2, %v2743_v13, %v2715_v54  ;;  %v2542_v20 = vpop.f32.mrf.mxu0 }
 0x571   : > { %v2749_v21 = vsel %vm2748_vm3, %v2746_v1, %v2723_v57  ;;  %v2543_v22 = vadd.f32 %v2542_v20, %v2500_v18 }
 0x572   : > { %2756 = vst [vmem:[%s4144_s23] sm:$0xff] %v2749_v21 }
 0x573   : > { %v2574_v24 = vadd.f32 %v2573_v23, %v2543_v22 }
 0x575   : > { %v2738_v25 = vsel %vm2736_vm5, %v2574_v24, %v2693_v51 }
 0x576   : > { %v2741_v26 = vsel %vm2739_vm15, %v2738_v25, %v2701_v50 }
 0x577   : > { %v2744_v27 = vsel %vm2742_vm1, %v2741_v26, %v2709_v31 }
 0x578   : > { %v2747_v28 = vsel %vm2745_vm2, %v2744_v27, %v4140_v48 }
 0x579   : > { %v2750_v32 = vsel %vm2748_vm3, %v2747_v28, %v2725_v60 }
 0x57a   : > { %2758 = vst [vmem:[%s4144_s23 + $0x10] sm:$0xff] %v2750_v32 }
 0x57b   : > { %3274 = shalt.err (!%p3271_p12)
}
 0x57c   : > { %s3341_s8 = smov 256  }
 0x57d   : > { %2973 = dma.vmem_to_hbm [thread:$0]  (%p3474_p3), %s2775_s29, 512, %s2777_s21, %s2761_s7, %s3341_s8, %s3341_s8, %s3333_s24  }
 0x57e PF: > { %s4245_s30 = sld [smem:[#allocation16_spill]]  ;;  %p4247_p13 = scmp.ge.s32.totalorder %s3325_s20, 2 }
 0x580   : > { %p2990_p0 = pnand %p4247_p13, %p3437_p6 }
 0x582   : > { %p2991_p5 = pneg %p2990_p0 }
 0x584   : > { %s2791_s23 = sand.u32 1, %s4245_s30  }
 0x585   : > { %s2792_s16 = scalar_lea.sflag [#allocation4], %s2791_s23 }
 0x586   : > { %3308 = dma.done.wait (%p2991_p5), %s2792_s16, 512  }
 0x587   : > { %3310 = vsyncadd (%p2991_p5), %s2792_s16, 4294966784  ;;  %s4248_s20 = sld [smem:[#allocation19_spill]]  ;;  %s4251_s17 = smov %s3317_s18 }
 0x588   : > { %s4249_s25 = sld [smem:[#allocation17_spill]] }
 0x589   : > { %s4250_s19 = sld [smem:[#allocation21_spill]] }
 0x58d   : > { %p28_p7 = scmp.ge.s32.totalorder %s4248_s20, 4  }
 0x58e   : > { %s4252_s18 = smov %s4249_s25 }
 0x58f   :  { %30 = sbr.rel (!%p28_p7) target bundleno = 13 (0xd), region = 133 }
 0x594   :  { %2798 = vsyncpa [#allocation3], 1 }
 0x595   :  { %2800 = vsyncpa [#allocation3 + $0x1], 1 }
 0x596   :  { %2801 = vsyncpa [#allocation6], 1 }
 0x597   :  { %2803 = vsyncpa [#allocation6 + $0x1], 1 }
 0x598   :  { %2804 = vsyncpa [#allocation9], 1 }
 0x599   :  { %2805 = vsyncpa [#allocation4], 1 }
 0x59a   :  { %2807 = vsyncpa [#allocation4 + $0x1], 1 }

</bundles_post_ra>
